<compile_context>
chip_gen: v6e
topology: v6e:2x2x1
jax: 0.10.0
libtpu: 0.0.40
codegen_flags: <defaults>
</compile_context>

<pallas_src>
import jax
import jax.numpy as jnp
from jax.experimental import pallas as pl
from jax.experimental.pallas import tpu as pltpu


# ----------------------------- pre-pass kernel ---------------------------------

def _proj_pool_kernel(x_ref, wall_ref, ball_ref, wo_ref,
                      theta_ref, phit_ref, g2_ref):
    """Once per batch: fused theta|phi|g 1x1 conv (one wide matmul), 2x2 maxpool
    as a phase max, and the final 1x1 conv folded onto pooled g."""
    C8 = theta_ref.shape[0]
    Np = g2_ref.shape[1]

    x = x_ref[...]                                                    # (C, N) f32
    proj = (jnp.dot(wall_ref[...], x, preferred_element_type=jnp.float32)
            + ball_ref[...])                                          # (2*C8+C2, N)

    theta_ref[...] = proj[:C8].astype(theta_ref.dtype)                # (C8, N)

    pg = proj[C8:]                                                    # (C8+C2, N)
    # maxpool2x2 == elementwise max over the 4 contiguous phase blocks
    # (bias was added before the max; it commutes since it is per-channel).
    p01 = jnp.maximum(pg[:, 0 * Np:1 * Np], pg[:, 1 * Np:2 * Np])
    p23 = jnp.maximum(pg[:, 2 * Np:3 * Np], pg[:, 3 * Np:4 * Np])
    pool = jnp.maximum(p01, p23)                                      # (C8+C2, Np)

    # phi stored transposed (Np, C8) so the main kernel's score matmul is a
    # plain (Np, C8) @ (C8, TQ) with no in-kernel transpose.
    phit_ref[...] = pool[:C8].T.astype(phit_ref.dtype)                # (Np, C8)

    # Fold the output 1x1 conv into pooled g: it commutes with the per-query
    # softmax average, so the main kernel's attention matmul emits (C, TQ)
    # directly and the per-tile (C, C2)x(C2, TQ) epilogue matmul disappears.
    g2 = jnp.dot(wo_ref[...], pool[C8:], preferred_element_type=jnp.float32)
    g2_ref[...] = g2.astype(g2_ref.dtype)                             # (C, Np)


# ------------------------------ main attention kernel --------------------------

def _attn_kernel(x_ref, th_ref, phit_ref, g2_ref, bo_ref, sigma_ref, out_ref):
    C = out_ref.shape[0]

    # Keys on sublanes / queries on lanes: scores[m, n] = phi[:, m] . theta[:, n]
    scores = jnp.dot(phit_ref[...], th_ref[...],
                     preferred_element_type=jnp.float32)              # (Np, TQ)
    scores = scores - jnp.max(scores, axis=0, keepdims=True)          # sublane max
    e = jnp.exp(scores).astype(g2_ref.dtype)                          # bf16 MXU operand

    # (C+1, Np) @ (Np, TQ): row C of g2_ref is all-ones, so row C of the result
    # is the softmax denominator (folded into the MXU as one extra output row).
    acc = jnp.dot(g2_ref[...], e, preferred_element_type=jnp.float32)  # (C+1, TQ)
    inv_denom = pl.reciprocal(acc[C:C + 1, :], approx=True)            # EUP slot
    attn_out = acc[:C, :] * inv_denom + bo_ref[...]                    # (C, TQ)

    out_ref[...] = x_ref[...] + sigma_ref[0, 0] * attn_out             # lane-dense


# ------------------------------ wrapper -----------------------------------------

def _pick_tile(n, cap):
    """Largest multiple of 128 that divides n and is <= cap; else n (small maps)."""
    best, t = 0, 128
    while t <= min(n, cap):
        if n % t == 0:
            best = t
        t += 128
    return best if best > 0 else n


def _tpu_budget():
    """(vmem_limit_bytes, query-tile cap) per TPU generation."""
    try:
        vmem = pltpu.get_tpu_info().vmem_capacity_bytes
    except Exception:
        vmem = 64 * 1024 * 1024
    if vmem >= 100 * 1024 * 1024:          # v5e / v6e: 128 MiB physical VMEM
        return 64 * 1024 * 1024, 1024
    return 48 * 1024 * 1024, 256           # v7x: 64 MiB physical VMEM


def self_attn_pallas(x, params):
    """x: (B, C, H, W) float32 (NCHW, like the PyTorch module)."""
    wt, bt, wp_, bp_, wg, bg, wo, bo, sigma = params   # weights are (Cout, Cin)
    B, C, H, W = x.shape
    assert C % 8 == 0 and H % 2 == 0 and W % 2 == 0
    N = H * W
    Np = N // 4
    C8, C2 = C // 8, C // 2
    Hh, Wh = H // 2, W // 2

    vmem_limit, tq_cap = _tpu_budget()
    TQ = _pick_tile(N, tq_cap)
    num_q = N // TQ

    # Layout glue (plain XLA): NCHW -> channels-on-sublanes / pixels-on-lanes,
    # pixels permuted into phase order:
    #   x_perm[b, c, (2*ph + pw)*Np + hp*Wh + wp] = x[b, c, 2*hp + ph, 2*wp + pw]
    x_perm = (x.reshape(B, C, Hh, 2, Wh, 2)
                .transpose(0, 1, 3, 5, 2, 4)
                .reshape(B, C, N))

    # Fused theta|phi|g projection weights for the pre-pass (one wide matmul).
    w_all = jnp.concatenate([wt, wp_, wg], axis=0)                 # (2*C8 + C2, C)
    b_all = jnp.concatenate([bt, bp_, bg], axis=0).reshape(-1, 1)
    b_o = bo.reshape(C, 1)
    sig = jnp.reshape(sigma, (1, 1)).astype(jnp.float32)

    def rep(shape):
        return pl.BlockSpec(shape, lambda b: (0,) * len(shape))

    # ---- pre-pass: once-per-batch projections + pool, hoisted out of the main
    # kernel so x can be tiled by TQ and both main-grid axes stay "parallel".
    theta, phi_t, g2 = pl.pallas_call(
        _proj_pool_kernel,
        out_shape=(jax.ShapeDtypeStruct((B, C8, N), jnp.bfloat16),
                   jax.ShapeDtypeStruct((B, Np, C8), jnp.bfloat16),
                   jax.ShapeDtypeStruct((B, C, Np), jnp.bfloat16)),
        grid=(B,),
        in_specs=[pl.BlockSpec((None, C, N), lambda b: (b, 0, 0)),
                  rep((2 * C8 + C2, C)), rep((2 * C8 + C2, 1)), rep((C, C2))],
        out_specs=(pl.BlockSpec((None, C8, N), lambda b: (b, 0, 0)),
                   pl.BlockSpec((None, Np, C8), lambda b: (b, 0, 0)),
                   pl.BlockSpec((None, C, Np), lambda b: (b, 0, 0))),
        compiler_params=pltpu.CompilerParams(
            dimension_semantics=("parallel",), vmem_limit_bytes=vmem_limit),
    )(x_perm, w_all, b_all, wo)

    # Append an all-ones row so the attention matmul also emits the softmax
    # denominator as row C (one extra MXU output row, essentially free).
    g2_aug = jnp.concatenate(
        [g2, jnp.ones((B, 1, Np), jnp.bfloat16)], axis=1)          # (B, C+1, Np)

    out_perm = pl.pallas_call(
        _attn_kernel,
        out_shape=jax.ShapeDtypeStruct((B, C, N), jnp.float32),
        grid=(B, num_q),
        in_specs=[
            pl.BlockSpec((None, C, TQ), lambda b, q: (b, 0, q)),        # x tile
            pl.BlockSpec((None, C8, TQ), lambda b, q: (b, 0, q)),       # theta tile
            pl.BlockSpec((None, Np, C8), lambda b, q: (b, 0, 0)),       # pooled phi^T
            pl.BlockSpec((None, C + 1, Np), lambda b, q: (b, 0, 0)),    # W_o@g_pool (+ones)
            pl.BlockSpec((C, 1), lambda b, q: (0, 0)),                  # b_o
            pl.BlockSpec(memory_space=pltpu.MemorySpace.SMEM),          # sigma scalar
        ],
        out_specs=pl.BlockSpec((None, C, TQ), lambda b, q: (b, 0, q)),
        compiler_params=pltpu.CompilerParams(
            dimension_semantics=("parallel", "parallel"),
            vmem_limit_bytes=vmem_limit),
    )(x_perm, theta, phi_t, g2_aug, b_o, sig)

    # Undo the phase permutation: (B, C, 2, 2, Hh, Wh) -> (B, C, H, W).
    out = (out_perm.reshape(B, C, 2, 2, Hh, Wh)
                   .transpose(0, 1, 4, 2, 5, 3)
                   .reshape(B, C, H, W))
    return out


# ------------------------- parameter setup (plain JAX) -------------------------

def _spectral_normalize(w, n_iter=50, eps=1e-12):
    # torch.nn.utils.spectral_norm: divide weight by its largest singular value
    # (power iteration), done here deterministically as weight preprocessing.
    u = jnp.full((w.shape[0],), 1.0 / jnp.sqrt(w.shape[0]), w.dtype)
    for _ in range(n_iter):
        v = w.T @ u
        v = v / (jnp.linalg.norm(v) + eps)
        u = w @ v
        u = u / (jnp.linalg.norm(u) + eps)
    s = u @ (w @ v)
    return w / s


def _make_snconv1x1(key, cin, cout):
    kw, kb = jax.random.split(key)
    w = jax.random.normal(kw, (cout, cin), jnp.float32) * 0.2   # Conv2d weight[:, :, 0, 0]
    w = _spectral_normalize(w)
    b = jax.random.normal(kb, (cout,), jnp.float32) * 0.05
    return w, b                                                 # (Cout, Cin), (Cout,)


# ------------------------- pure-JAX reference (torch semantics) ----------------

def self_attn_reference(x, params):
    wt, bt, wp_, bp_, wg, bg, wo, bo, sigma = params
    B, C, H, W = x.shape
    N, Np = H * W, H * W // 4

    def conv1x1(inp, w, b):        # w: (Cout, Cin)
        return jnp.einsum('bchw,oc->bohw', inp, w) + b[None, :, None, None]

    def maxpool2(inp):
        b_, c_, h_, w_ = inp.shape
        return jnp.max(inp.reshape(b_, c_, h_ // 2, 2, w_ // 2, 2), axis=(3, 5))

    theta = conv1x1(x, wt, bt).reshape(B, C // 8, N)
    phi = maxpool2(conv1x1(x, wp_, bp_)).reshape(B, C // 8, Np)
    attn = jax.nn.softmax(jnp.einsum('bcn,bcm->bnm', theta, phi), axis=-1)   # (B, N, Np)
    g = maxpool2(conv1x1(x, wg, bg)).reshape(B, C // 2, Np)
    attn_g = jnp.einsum('bcm,bnm->bcn', g, attn).reshape(B, C // 2, H, W)
    attn_g = conv1x1(attn_g, wo, bo)
    return x + sigma * attn_g


if __name__ == "__main__":
    key = jax.random.PRNGKey(0)
    kt, kp, kg, ko, kx = jax.random.split(key, 5)
    B, C, H, W = 2, 64, 32, 32      # in_channels must be divisible by 8

    wt, bt = _make_snconv1x1(kt, C, C // 8)
    wp_, bp_ = _make_snconv1x1(kp, C, C // 8)
    wg, bg = _make_snconv1x1(kg, C, C // 2)
    wo, bo = _make_snconv1x1(ko, C // 2, C)
    # module __init__ has sigma = nn.Parameter(torch.zeros(1)); use a nonzero
    # deterministic value so the attention branch actually affects the output.
    sigma = jnp.float32(0.75)
    params = (wt, bt, wp_, bp_, wg, bg, wo, bo, sigma)

    x = jax.random.normal(kx, (B, C, H, W), jnp.float32)

    out = jax.block_until_ready(jax.jit(self_attn_pallas)(x, params))
    ref = self_attn_reference(x, params)

    assert out.shape == x.shape and out.dtype == x.dtype
    max_err = float(jnp.max(jnp.abs(out - ref)))
    # bf16 MXU operands + approx EUP reciprocal (per perf review) -> ~1e-2-scale
    # parity vs the f32 reference instead of the old 1e-4.
    assert jnp.allclose(out, ref, rtol=3e-2, atol=3e-2), f"max abs err = {max_err}"
    print("KERNEL_OK")
</pallas_src>

<mosaic_0001>
module attributes {stable_mosaic.version = 11 : i64} {
  func.func @_proj_pool_kernel(%arg0: i32, %arg1: memref<1x64x1024xf32, #tpu.memory_space<vmem>>, %arg2: memref<48x64xf32, #tpu.memory_space<vmem>>, %arg3: memref<48x1xf32, #tpu.memory_space<vmem>>, %arg4: memref<64x32xf32, #tpu.memory_space<vmem>>, %arg5: memref<1x8x1024xbf16, #tpu.memory_space<vmem>>, %arg6: memref<1x256x8xbf16, #tpu.memory_space<vmem>>, %arg7: memref<1x64x256xbf16, #tpu.memory_space<vmem>>) attributes {dimension_semantics = [#tpu.dimension_semantics<parallel>], iteration_bounds = array<i64: 2>, scalar_prefetch = 0 : i64, scratch_operands = 0 : i64, tpu.core_type = #tpu.core_type<tc>, window_params = [{transform_indices = @transform_0, window_bounds = array<i64: 1, 64, 1024>}, {pipeline_mode = #tpu.pipeline_mode<synchronous>, transform_indices = @transform_1, window_bounds = array<i64: 48, 64>}, {pipeline_mode = #tpu.pipeline_mode<synchronous>, transform_indices = @transform_2, window_bounds = array<i64: 48, 1>}, {pipeline_mode = #tpu.pipeline_mode<synchronous>, transform_indices = @transform_3, window_bounds = array<i64: 64, 32>}, {transform_indices = @transform_4, window_bounds = array<i64: 1, 8, 1024>}, {transform_indices = @transform_5, window_bounds = array<i64: 1, 256, 8>}, {transform_indices = @transform_6, window_bounds = array<i64: 1, 64, 256>}]} {
    %c0 = arith.constant 0 : index
    %c0_0 = arith.constant 0 : index
    %c0_1 = arith.constant 0 : index
    %0 = vector.load %arg1[%c0, %c0_0, %c0_1] : memref<1x64x1024xf32, #tpu.memory_space<vmem>>, vector<1x64x1024xf32>
    %1 = vector.shape_cast %0 : vector<1x64x1024xf32> to vector<64x1024xf32>
    %c0_2 = arith.constant 0 : index
    %c0_3 = arith.constant 0 : index
    %2 = vector.load %arg2[%c0_2, %c0_3] : memref<48x64xf32, #tpu.memory_space<vmem>>, vector<48x64xf32>
    %cst = arith.constant dense<0.000000e+00> : vector<48x1024xf32>
    %3 = tpu.matmul %2, %1, %cst {dimension_numbers = #tpu.dot_dimension_numbers<[1], [0], [0], [1], [0, 0, 1, 1], [], []>} : vector<48x64xf32>, vector<64x1024xf32>, vector<48x1024xf32> -> vector<48x1024xf32>
    %c0_4 = arith.constant 0 : index
    %c0_5 = arith.constant 0 : index
    %4 = vector.load %arg3[%c0_4, %c0_5] : memref<48x1xf32, #tpu.memory_space<vmem>>, vector<48x1xf32>
    %5 = vector.broadcast %4 : vector<48x1xf32> to vector<48x1024xf32>
    %6 = arith.addf %3, %5 : vector<48x1024xf32>
    %7 = vector.extract_strided_slice %6 {offsets = [0, 0], sizes = [8, 1024], strides = [1, 1]} : vector<48x1024xf32> to vector<8x1024xf32>
    %8 = arith.truncf %7 : vector<8x1024xf32> to vector<8x1024xbf16>
    %c0_6 = arith.constant 0 : index
    %c0_7 = arith.constant 0 : index
    %c0_8 = arith.constant 0 : index
    %9 = vector.load %arg5[%c0_6, %c0_7, %c0_8] : memref<1x8x1024xbf16, #tpu.memory_space<vmem>>, vector<1x8x1024xbf16>
    %10 = vector.shape_cast %9 : vector<1x8x1024xbf16> to vector<8x1024xbf16>
    %11 = vector.shape_cast %8 : vector<8x1024xbf16> to vector<1x8x1024xbf16>
    tpu.vector_store %arg5[%c0_6, %c0_7, %c0_8], %11 {strides = array<i32>} : memref<1x8x1024xbf16, #tpu.memory_space<vmem>>, vector<1x8x1024xbf16>,
    %12 = vector.extract_strided_slice %6 {offsets = [8, 0], sizes = [40, 1024], strides = [1, 1]} : vector<48x1024xf32> to vector<40x1024xf32>
    %13 = vector.extract_strided_slice %12 {offsets = [0, 0], sizes = [40, 256], strides = [1, 1]} : vector<40x1024xf32> to vector<40x256xf32>
    %14 = vector.extract_strided_slice %12 {offsets = [0, 256], sizes = [40, 256], strides = [1, 1]} : vector<40x1024xf32> to vector<40x256xf32>
    %15 = arith.maximumf %13, %14 : vector<40x256xf32>
    %16 = vector.extract_strided_slice %12 {offsets = [0, 512], sizes = [40, 256], strides = [1, 1]} : vector<40x1024xf32> to vector<40x256xf32>
    %17 = vector.extract_strided_slice %12 {offsets = [0, 768], sizes = [40, 256], strides = [1, 1]} : vector<40x1024xf32> to vector<40x256xf32>
    %18 = arith.maximumf %16, %17 : vector<40x256xf32>
    %19 = arith.maximumf %15, %18 : vector<40x256xf32>
    %20 = vector.extract_strided_slice %19 {offsets = [0, 0], sizes = [8, 256], strides = [1, 1]} : vector<40x256xf32> to vector<8x256xf32>
    %21 = tpu.transpose %20, [1, 0] : vector<8x256xf32> -> vector<256x8xf32>
    %22 = arith.truncf %21 : vector<256x8xf32> to vector<256x8xbf16>
    %c0_9 = arith.constant 0 : index
    %c0_10 = arith.constant 0 : index
    %c0_11 = arith.constant 0 : index
    %23 = vector.load %arg6[%c0_9, %c0_10, %c0_11] : memref<1x256x8xbf16, #tpu.memory_space<vmem>>, vector<1x256x8xbf16>
    %24 = vector.shape_cast %23 : vector<1x256x8xbf16> to vector<256x8xbf16>
    %25 = vector.shape_cast %22 : vector<256x8xbf16> to vector<1x256x8xbf16>
    tpu.vector_store %arg6[%c0_9, %c0_10, %c0_11], %25 {strides = array<i32>} : memref<1x256x8xbf16, #tpu.memory_space<vmem>>, vector<1x256x8xbf16>,
    %c0_12 = arith.constant 0 : index
    %c0_13 = arith.constant 0 : index
    %26 = vector.load %arg4[%c0_12, %c0_13] : memref<64x32xf32, #tpu.memory_space<vmem>>, vector<64x32xf32>
    %27 = vector.extract_strided_slice %19 {offsets = [8, 0], sizes = [32, 256], strides = [1, 1]} : vector<40x256xf32> to vector<32x256xf32>
    %cst_14 = arith.constant dense<0.000000e+00> : vector<64x256xf32>
    %28 = tpu.matmul %26, %27, %cst_14 {dimension_numbers = #tpu.dot_dimension_numbers<[1], [0], [0], [1], [0, 0, 1, 1], [], []>} : vector<64x32xf32>, vector<32x256xf32>, vector<64x256xf32> -> vector<64x256xf32>
    %29 = arith.truncf %28 : vector<64x256xf32> to vector<64x256xbf16>
    %c0_15 = arith.constant 0 : index
    %c0_16 = arith.constant 0 : index
    %c0_17 = arith.constant 0 : index
    %30 = vector.load %arg7[%c0_15, %c0_16, %c0_17] : memref<1x64x256xbf16, #tpu.memory_space<vmem>>, vector<1x64x256xbf16>
    %31 = vector.shape_cast %30 : vector<1x64x256xbf16> to vector<64x256xbf16>
    %32 = vector.shape_cast %29 : vector<64x256xbf16> to vector<1x64x256xbf16>
    tpu.vector_store %arg7[%c0_15, %c0_16, %c0_17], %32 {strides = array<i32>} : memref<1x64x256xbf16, #tpu.memory_space<vmem>>, vector<1x64x256xbf16>,
    return
  }
  func.func @transform_0(%arg0: i32) -> (i32, i32, i32) {
    %c0_i32 = arith.constant 0 : i32
    %c0_i32_0 = arith.constant 0 : i32
    %c0_i32_1 = arith.constant 0 : i32
    return %arg0, %c0_i32, %c0_i32_0 : i32, i32, i32
  }
  func.func @transform_1(%arg0: i32) -> (i32, i32) {
    %c0_i32 = arith.constant 0 : i32
    %c0_i32_0 = arith.constant 0 : i32
    %c0_i32_1 = arith.constant 0 : i32
    return %c0_i32, %c0_i32_0 : i32, i32
  }
  func.func @transform_2(%arg0: i32) -> (i32, i32) {
    %c0_i32 = arith.constant 0 : i32
    %c0_i32_0 = arith.constant 0 : i32
    %c0_i32_1 = arith.constant 0 : i32
    return %c0_i32, %c0_i32_0 : i32, i32
  }
  func.func @transform_3(%arg0: i32) -> (i32, i32) {
    %c0_i32 = arith.constant 0 : i32
    %c0_i32_0 = arith.constant 0 : i32
    %c0_i32_1 = arith.constant 0 : i32
    return %c0_i32, %c0_i32_0 : i32, i32
  }
  func.func @transform_4(%arg0: i32) -> (i32, i32, i32) {
    %c0_i32 = arith.constant 0 : i32
    %c0_i32_0 = arith.constant 0 : i32
    %c0_i32_1 = arith.constant 0 : i32
    return %arg0, %c0_i32, %c0_i32_0 : i32, i32, i32
  }
  func.func @transform_5(%arg0: i32) -> (i32, i32, i32) {
    %c0_i32 = arith.constant 0 : i32
    %c0_i32_0 = arith.constant 0 : i32
    %c0_i32_1 = arith.constant 0 : i32
    return %arg0, %c0_i32, %c0_i32_0 : i32, i32, i32
  }
  func.func @transform_6(%arg0: i32) -> (i32, i32, i32) {
    %c0_i32 = arith.constant 0 : i32
    %c0_i32_0 = arith.constant 0 : i32
    %c0_i32_1 = arith.constant 0 : i32
    return %arg0, %c0_i32, %c0_i32_0 : i32, i32, i32
  }
}

module attributes {stable_mosaic.version = 11 : i64} {
  func.func @_attn_kernel(%arg0: i32, %arg1: i32, %arg2: memref<1x64x256xf32, #tpu.memory_space<vmem>>, %arg3: memref<1x8x256xbf16, #tpu.memory_space<vmem>>, %arg4: memref<1x256x8xbf16, #tpu.memory_space<vmem>>, %arg5: memref<1x65x256xbf16, #tpu.memory_space<vmem>>, %arg6: memref<64x1xf32, #tpu.memory_space<vmem>>, %arg7: memref<1x1xf32, #tpu.memory_space<smem>>, %arg8: memref<1x64x256xf32, #tpu.memory_space<vmem>>) attributes {dimension_semantics = [#tpu.dimension_semantics<parallel>, #tpu.dimension_semantics<parallel>], iteration_bounds = array<i64: 2, 4>, scalar_prefetch = 0 : i64, scratch_operands = 0 : i64, tpu.core_type = #tpu.core_type<tc>, window_params = [{transform_indices = @transform_0, window_bounds = array<i64: 1, 64, 256>}, {transform_indices = @transform_1, window_bounds = array<i64: 1, 8, 256>}, {transform_indices = @transform_2, window_bounds = array<i64: 1, 256, 8>}, {transform_indices = @transform_3, window_bounds = array<i64: 1, 65, 256>}, {pipeline_mode = #tpu.pipeline_mode<synchronous>, transform_indices = @transform_4, window_bounds = array<i64: 64, 1>}, {transform_indices = @transform_5, window_bounds = array<i64: 1, 1>}, {transform_indices = @transform_6, window_bounds = array<i64: 1, 64, 256>}]} {
    %c0 = arith.constant 0 : index
    %c0_0 = arith.constant 0 : index
    %c0_1 = arith.constant 0 : index
    %0 = vector.load %arg4[%c0, %c0_0, %c0_1] : memref<1x256x8xbf16, #tpu.memory_space<vmem>>, vector<1x256x8xbf16>
    %1 = vector.shape_cast %0 : vector<1x256x8xbf16> to vector<256x8xbf16>
    %c0_2 = arith.constant 0 : index
    %c0_3 = arith.constant 0 : index
    %c0_4 = arith.constant 0 : index
    %2 = vector.load %arg3[%c0_2, %c0_3, %c0_4] : memref<1x8x256xbf16, #tpu.memory_space<vmem>>, vector<1x8x256xbf16>
    %3 = vector.shape_cast %2 : vector<1x8x256xbf16> to vector<8x256xbf16>
    %cst = arith.constant dense<0.000000e+00> : vector<256x256xf32>
    %4 = tpu.matmul %1, %3, %cst {dimension_numbers = #tpu.dot_dimension_numbers<[1], [0], [0], [1], [0, 0, 1, 1], [], []>} : vector<256x8xbf16>, vector<8x256xbf16>, vector<256x256xf32> -> vector<256x256xf32>
    %cst_5 = arith.constant dense<0xFF800000> : vector<256xf32>
    %5 = vector.multi_reduction <maximumf>, %4, %cst_5 [0] : vector<256x256xf32> to vector<256xf32>
    %6 = vector.shape_cast %5 : vector<256xf32> to vector<1x256xf32>
    %7 = vector.broadcast %6 : vector<1x256xf32> to vector<256x256xf32>
    %8 = arith.subf %4, %7 : vector<256x256xf32>
    %9 = math.exp %8 : vector<256x256xf32>
    %10 = arith.truncf %9 : vector<256x256xf32> to vector<256x256xbf16>
    %c0_6 = arith.constant 0 : index
    %c0_7 = arith.constant 0 : index
    %c0_8 = arith.constant 0 : index
    %11 = vector.load %arg5[%c0_6, %c0_7, %c0_8] : memref<1x65x256xbf16, #tpu.memory_space<vmem>>, vector<1x65x256xbf16>
    %12 = vector.shape_cast %11 : vector<1x65x256xbf16> to vector<65x256xbf16>
    %cst_9 = arith.constant dense<0.000000e+00> : vector<65x256xf32>
    %13 = tpu.matmul %12, %10, %cst_9 {dimension_numbers = #tpu.dot_dimension_numbers<[1], [0], [0], [1], [0, 0, 1, 1], [], []>} : vector<65x256xbf16>, vector<256x256xbf16>, vector<65x256xf32> -> vector<65x256xf32>
    %14 = vector.extract_strided_slice %13 {offsets = [64, 0], sizes = [1, 256], strides = [1, 1]} : vector<65x256xf32> to vector<1x256xf32>
    %15 = tpu.reciprocal %14 {approx = true} : vector<1x256xf32> -> vector<1x256xf32>
    %16 = vector.extract_strided_slice %13 {offsets = [0, 0], sizes = [64, 256], strides = [1, 1]} : vector<65x256xf32> to vector<64x256xf32>
    %17 = vector.broadcast %15 : vector<1x256xf32> to vector<64x256xf32>
    %18 = arith.mulf %16, %17 : vector<64x256xf32>
    %c0_10 = arith.constant 0 : index
    %c0_11 = arith.constant 0 : index
    %19 = vector.load %arg6[%c0_10, %c0_11] : memref<64x1xf32, #tpu.memory_space<vmem>>, vector<64x1xf32>
    %20 = vector.broadcast %19 : vector<64x1xf32> to vector<64x256xf32>
    %21 = arith.addf %18, %20 : vector<64x256xf32>
    %c0_12 = arith.constant 0 : index
    %c0_13 = arith.constant 0 : index
    %c0_14 = arith.constant 0 : index
    %22 = vector.load %arg2[%c0_12, %c0_13, %c0_14] : memref<1x64x256xf32, #tpu.memory_space<vmem>>, vector<1x64x256xf32>
    %23 = vector.shape_cast %22 : vector<1x64x256xf32> to vector<64x256xf32>
    %c0_15 = arith.constant 0 : index
    %c0_16 = arith.constant 0 : index
    %24 = memref.load %arg7[%c0_15, %c0_16] : memref<1x1xf32, #tpu.memory_space<smem>>
    %25 = vector.broadcast %24 : f32 to vector<64x256xf32>
    %26 = arith.mulf %25, %21 : vector<64x256xf32>
    %27 = arith.addf %23, %26 : vector<64x256xf32>
    %c0_17 = arith.constant 0 : index
    %c0_18 = arith.constant 0 : index
    %c0_19 = arith.constant 0 : index
    %28 = vector.load %arg8[%c0_17, %c0_18, %c0_19] : memref<1x64x256xf32, #tpu.memory_space<vmem>>, vector<1x64x256xf32>
    %29 = vector.shape_cast %28 : vector<1x64x256xf32> to vector<64x256xf32>
    %30 = vector.shape_cast %27 : vector<64x256xf32> to vector<1x64x256xf32>
    tpu.vector_store %arg8[%c0_17, %c0_18, %c0_19], %30 {strides = array<i32>} : memref<1x64x256xf32, #tpu.memory_space<vmem>>, vector<1x64x256xf32>,
    return
  }
  func.func @transform_0(%arg0: i32, %arg1: i32) -> (i32, i32, i32) {
    %c0_i32 = arith.constant 0 : i32
    %c0_i32_0 = arith.constant 0 : i32
    return %arg0, %c0_i32, %arg1 : i32, i32, i32
  }
  func.func @transform_1(%arg0: i32, %arg1: i32) -> (i32, i32, i32) {
    %c0_i32 = arith.constant 0 : i32
    %c0_i32_0 = arith.constant 0 : i32
    return %arg0, %c0_i32, %arg1 : i32, i32, i32
  }
  func.func @transform_2(%arg0: i32, %arg1: i32) -> (i32, i32, i32) {
    %c0_i32 = arith.constant 0 : i32
    %c0_i32_0 = arith.constant 0 : i32
    %c0_i32_1 = arith.constant 0 : i32
    return %arg0, %c0_i32, %c0_i32_0 : i32, i32, i32
  }
  func.func @transform_3(%arg0: i32, %arg1: i32) -> (i32, i32, i32) {
    %c0_i32 = arith.constant 0 : i32
    %c0_i32_0 = arith.constant 0 : i32
    %c0_i32_1 = arith.constant 0 : i32
    return %arg0, %c0_i32, %c0_i32_0 : i32, i32, i32
  }
  func.func @transform_4(%arg0: i32, %arg1: i32) -> (i32, i32) {
    %c0_i32 = arith.constant 0 : i32
    %c0_i32_0 = arith.constant 0 : i32
    %c0_i32_1 = arith.constant 0 : i32
    return %c0_i32, %c0_i32_0 : i32, i32
  }
  func.func @transform_5(%arg0: i32, %arg1: i32) -> (i32, i32) {
    %c0_i32 = arith.constant 0 : i32
    %c0_i32_0 = arith.constant 0 : i32
    %c0_i32_1 = arith.constant 0 : i32
    return %c0_i32, %c0_i32_0 : i32, i32
  }
  func.func @transform_6(%arg0: i32, %arg1: i32) -> (i32, i32, i32) {
    %c0_i32 = arith.constant 0 : i32
    %c0_i32_0 = arith.constant 0 : i32
    return %arg0, %c0_i32, %arg1 : i32, i32, i32
  }
}

</mosaic_0001>

<bundles_post_ra>
// kernel: self_attn_pallas.3
= control target key start
LH: loop header
LB: loop body
LE: loop exit
PB: predicated region body
PF: predicated region fallthrough
CT: control target
= control target key end

     0   :  { %s2643_s0 = inlined_call_operand.vmem [shape: f32[2,64,1024], index: 0, kind: input, shape index: {}]   ;;  %s2644_s1 = inlined_call_operand.vmem [shape: bf16[2,8,1024], index: 1, kind: input, shape index: {}]   ;;  %s2645_s2 = inlined_call_operand.vmem [shape: bf16[2,256,8], index: 2, kind: input, shape index: {}]   ;;  %s2646_s3 = inlined_call_operand.vmem [shape: bf16[2,65,256], index: 3, kind: input, shape index: {}]   ;;  %s2647_s4 = inlined_call_operand.vmem [shape: f32[64,1], index: 4, kind: input, shape index: {}]   ;;  %s2648_s5 = inlined_call_operand.<no memory space> [shape: f32[1,1], index: 5, kind: input, shape index: {}]   ;;  %s2649_s6 = inlined_call_operand.vmem [shape: f32[2,64,1024], index: 6, kind: output, shape index: {}]  }
   0x1   :  { %11 = sst [smem:[#allocation2]] %s2648_s5 }
   0x2   :  { %s1915_s23 = smov 0   ;;  %s1917_s24 = smov 0  }
   0x3   :  { %s1919_s25 = smov 0   ;;  %s1921_s26 = smov 0  }
   0x4   :  { %s1923_s27 = smov 0   ;;  %s1925_s28 = smov 0  }
   0x5   :  { %s1927_s29 = smov 0  }
   0x6 LB: > { %s26_s5 = sadd.s32 1, %s1866_s27  ;;  %s29_s30 = sadd.s32 1, %s1870_s28  ;;  %s1874_s29 = sphi %s1927_s29, %s17_s29   ;;  %s1870_s28 = sphi %s1925_s28, %s2713_s28   ;;  %s1866_s27 = sphi %s1923_s27, %s2712_s27   ;;  %s1862_s26 = sphi %s1921_s26, %s2711_s26   ;;  %s1858_s25 = sphi %s1919_s25, %s2710_s25   ;;  %s1854_s24 = sphi %s1917_s24, %s2709_s24   ;;  %s1850_s23 = sphi %s1915_s23, %s2708_s23  }
   0x7   : > { %p27_p0 = scmp.ge.s32.totalorder %s26_s5, 4  ;;  %s1527_s7 = sadd.s32 4294967295, %s1874_s29  }
   0x8   : > { %p45_p1 = scmp.ne.s32.totalorder %s1854_s24, %s1850_s23  ;;  %p46_p2 = scmp.eq.s32.totalorder %s1874_s29, 0 }
   0x9   : > { %s2715_s5 = smov (%p27_p0, %s26_s5), 0  ;;  %s2717_s30 = smov (!%p27_p0, %s29_s30), %s1870_s28 }
   0xa   : > { %p31_p3 = scmp.ge.s32.totalorder %s2717_s30, 2  ;;  %p199_p4 = scmp.eq.s32.totalorder %s1527_s7, 7 }
   0xb   : > { %s34_s8 = ssub.s32 %s1866_s27, %s2715_s5  ;;  %p47_p5 = por %p46_p2, %p45_p1 }
   0xc   : > { %s2719_s30 = smov (%p31_p3, %s2717_s30), 0  ;;  %p1963_p6 = por %p199_p4, %p45_p1 }
   0xd   : > { %s33_s10 = ssub.s32 %s1870_s28, %s2719_s30  ;;  %s38_s12 = sadd.s32 1, %s1854_s24 }
   0xe   : > { %s35_s11 = sor.u32 %s34_s8, %s33_s10  ;;  %p1530_p8 = scmp.ge.s32.totalorder %s1874_s29, 8 }
   0xf   : > { %p36_p7 = scmp.eq.s32.totalorder %s35_s11, 0 }
  0x10   : > { %227 = sbr.rel (%p1530_p8) target bundleno = 36 (0x24), region = 24 }
  0x11   : > { %s1971_s13 = scalar_select %p36_p7, %s1854_s24, %s38_s12  }
  0x15   : > { %230 = sbr.rel (!%p47_p5) target bundleno = 36 (0x24), region = 28  ;;  %s232_s14 = sand.u32 (%p47_p5), 1, %s1854_s24  }
  0x16   : > { %s1532_s15 = sshll.u32 (%p47_p5), %s1866_s27, 1  ;;  %s1531_s16 = sshll.u32 (%p47_p5), %s232_s14, 7 }
  0x17   : > { %s1533_s17 = sshll.u32 (%p47_p5), %s1870_s28, 6  ;;  %s234_s7 = scalar_lea.vmem (%p47_p5), [#allocation3], %s1531_s16 }
  0x18   : > { %s237_s18 = sadd.s32 (%p47_p5), %s1533_s17, %s1532_s15 }
  0x19   : > { %s1534_s19 = sshll.u32 (%p47_p5), %s237_s18, 3 }
  0x1a   : > { %s1980_s22 = scalar_lea.vmem %s2643_s0, %s1534_s19 }
  0x1b   : > { %v252_v0 = vld [vmem:[%s1980_s22] sm:$0xff]  ;;  %v254_v1 = vld [vmem:[%s1980_s22 + $0x8] sm:$0xff] }
  0x1c   : > { %v256_v2 = vld [vmem:[%s1980_s22 + $0x40] sm:$0xff]  ;;  %253 = vst [vmem:[%s234_s7] sm:$0xff] %v252_v0  ;;  %255 = vst [vmem:[%s234_s7 + $0x8] sm:$0xff] %v254_v1  ;;  %v258_v3 = vld [vmem:[%s1980_s22 + $0x48] sm:$0xff] }
  0x1d   : > { %257 = vst [vmem:[%s234_s7 + $0x10] sm:$0xff] %v256_v2  ;;  %v260_v4 = vld [vmem:[%s1980_s22 + $0x80] sm:$0xff]  ;;  %v262_v5 = vld [vmem:[%s1980_s22 + $0x88] sm:$0xff]  ;;  %259 = vst [vmem:[%s234_s7 + $0x18] sm:$0xff] %v258_v3 }
  0x1e   : > { %261 = vst [vmem:[%s234_s7 + $0x20] sm:$0xff] %v260_v4  ;;  %263 = vst [vmem:[%s234_s7 + $0x28] sm:$0xff] %v262_v5  ;;  %v264_v6 = vld [vmem:[%s1980_s22 + $0xc0] sm:$0xff]  ;;  %v266_v7 = vld [vmem:[%s1980_s22 + $0xc8] sm:$0xff] }
  0x1f   : > { %v268_v8 = vld [vmem:[%s1980_s22 + $0x100] sm:$0xff]  ;;  %265 = vst [vmem:[%s234_s7 + $0x30] sm:$0xff] %v264_v6  ;;  %267 = vst [vmem:[%s234_s7 + $0x38] sm:$0xff] %v266_v7  ;;  %v270_v9 = vld [vmem:[%s1980_s22 + $0x108] sm:$0xff] }
  0x20   : > { %269 = vst [vmem:[%s234_s7 + $0x40] sm:$0xff] %v268_v8  ;;  %v272_v10 = vld [vmem:[%s1980_s22 + $0x140] sm:$0xff]  ;;  %v274_v11 = vld [vmem:[%s1980_s22 + $0x148] sm:$0xff]  ;;  %271 = vst [vmem:[%s234_s7 + $0x48] sm:$0xff] %v270_v9 }
  0x21   : > { %273 = vst [vmem:[%s234_s7 + $0x50] sm:$0xff] %v272_v10  ;;  %275 = vst [vmem:[%s234_s7 + $0x58] sm:$0xff] %v274_v11  ;;  %v276_v12 = vld [vmem:[%s1980_s22 + $0x180] sm:$0xff]  ;;  %v278_v13 = vld [vmem:[%s1980_s22 + $0x188] sm:$0xff] }
  0x22   : > { %v280_v14 = vld [vmem:[%s1980_s22 + $0x1c0] sm:$0xff]  ;;  %277 = vst [vmem:[%s234_s7 + $0x60] sm:$0xff] %v276_v12  ;;  %279 = vst [vmem:[%s234_s7 + $0x68] sm:$0xff] %v278_v13  ;;  %v282_v15 = vld [vmem:[%s1980_s22 + $0x1c8] sm:$0xff] }
  0x23   : > { %281 = vst [vmem:[%s234_s7 + $0x70] sm:$0xff] %v280_v14  ;;  %283 = vst [vmem:[%s234_s7 + $0x78] sm:$0xff] %v282_v15 }
  0x24 PF: > { %p1535_p9 = scmp.ge.s32.totalorder %s1874_s29, 1  ;;  %p317_p10 = scmp.lt.s32.totalorder %s1874_s29, 9 }
  0x26   : > { %p318_p11 = pnand %p1535_p9, %p317_p10 }
  0x28   : > { %321 = sbr.rel (%p318_p11) target bundleno = 763 (0x2fb), region = 63 }
  0x2d   : > { %s2001_s8 = sshll.u32 %s1858_s25, 1  ;;  %p373_p12 = scmp.lt.s32.totalorder %s1862_s26, 1  ;;  %v1876_v16 = vmov 0   ;;  %vm561_vm0 = vcmask 1043456   ;;  %vm512_vm1 = vcmask 64512  }
  0x2e   : > { %p375_p13 = scmp.lt.s32.totalorder %s2001_s8, 7  ;;  %600 = vmatprep.mubr.bf16.mxu0 %v1876_v16  ;;  %1655 = vset.pattern.permute.xlu1 %v1876_v16  ;;  %s324_s16 = sand.u32 1, %s1850_s23  }
  0x2f   : > { %s374_s10 = scalar_select %p373_p12, %s1862_s26, 1  ;;  %1654 = vset.pattern.permute.xlu0 %v1876_v16 }
  0x30   : > { %s376_s11 = scalar_select %p375_p13, %s2001_s8, 7 }
  0x31   : > { %s1539_s12 = sshll.u32 %s374_s10, 3  ;;  %s1595_s14 = sshll.u32 %s374_s10, 7 }
  0x32   : > { %s378_s15 = sadd.s32 %s1539_s12, %s376_s11  ;;  %s2013_s25 = scalar_lea.vmem %s2645_s2, %s1595_s14 }
  0x33   : > { %s1540_s18 = sshll.u32 %s378_s15, 2  ;;  %v1658_v21 = vld [vmem:[%s2013_s25] sm:$0xff]   ;;  %s1596_s22 = smul.u32 72, %s374_s10  ;;  %v1659_v22 = vld [vmem:[%s2013_s25 + $0x8] sm:$0xff]   ;;  %v1660_v23 = vld [vmem:[%s2013_s25 + $0x10] sm:$0xff]  }
  0x34   : > { %s380_s21 = scalar_lea.vmem %s2644_s1, %s1540_s18  ;;  %v1661_v24 = vld [vmem:[%s2013_s25 + $0x18] sm:$0xff]   ;;  %v1662_v25 = vld [vmem:[%s2013_s25 + $0x20] sm:$0xff]   ;;  %v1663_v26 = vld [vmem:[%s2013_s25 + $0x28] sm:$0xff]   ;;  %s2513_s17 = sshll.u32 %s324_s16, 7 }
  0x35   : > { %v426_v17 = vld [vmem:[%s380_s21] sm:$0xff]  ;;  %s2025_s12 = scalar_lea.vmem %s2646_s3, %s1596_s22  ;;  %v1664_v27 = vld [vmem:[%s2013_s25 + $0x30] sm:$0xff]   ;;  %v1665_v28 = vld [vmem:[%s2013_s25 + $0x38] sm:$0xff]   ;;  %s2531_s23 = scalar_lea.vmem [#allocation3], %s2513_s17 }
  0x36   : > { %v1561_v18 = vcombine.high %v426_v17, %v426_v17  ;;  %v1560_v19 = vcombine.low %v426_v17, %v426_v17  ;;  %v1666_v29 = vld [vmem:[%s2013_s25 + $0x40] sm:$0xff]   ;;  %v1667_v30 = vld [vmem:[%s2013_s25 + $0x48] sm:$0xff]   ;;  %v1668_v31 = vld [vmem:[%s2013_s25 + $0x50] sm:$0xff]   ;;  %s1591_s18 = sshll.u32 (%p1963_p6), %s1862_s26, 6 }
  0x37   : > { %v1669_v32 = vld [vmem:[%s2013_s25 + $0x58] sm:$0xff]   ;;  %v1670_v33 = vld [vmem:[%s2013_s25 + $0x60] sm:$0xff]   ;;  %v1671_v34 = vld [vmem:[%s2013_s25 + $0x68] sm:$0xff]   ;;  %s1361_s9 = sadd.s32 (%p1963_p6), %s1591_s18, %s2001_s8 }
  0x38   : > { %1562 = vmatprep.subr.msk.bf16.mxu0 %vm561_vm0, %v1561_v18  ;;  %v563_v20 = vsel %vm561_vm0, %v1560_v19, 0  ;;  %v1672_v35 = vld [vmem:[%s2013_s25 + $0x70] sm:$0xff]   ;;  %v1673_v36 = vld [vmem:[%s2013_s25 + $0x78] sm:$0xff]   ;;  %s2554_s25 = scalar_lea.vmem [#allocation4], %s2513_s17  ;;  %s1592_s19 = sshll.u32 (%p1963_p6), %s1361_s9, 3 }
  0x39   : > { %583 = vmatpush1.bf16.msra.mxu0 %v563_v20  ;;  %s1363_s22 = scalar_lea.vmem (%p1963_p6), %s2649_s6, %s1592_s19 }
  0x3c   : > { %1563 = vmatmul.mubr.msk.bf16.vlgmr.msra.gmra.mxu0 %vm512_vm1, %v1658_v21 }
  0x3d   : > { %610 = vmatprep.mubr.bf16.mxu0 %v1876_v16 }
  0x44   : > { %1564 = vmatmul.mubr.msk.bf16.gmra.mxu0 %vm512_vm1, %v1659_v22 }
  0x45   : > { %620 = vmatprep.mubr.bf16.mxu0 %v1876_v16 }
  0x4c   : > { %1565 = vmatmul.mubr.msk.bf16.gmra.mxu0 %vm512_vm1, %v1660_v23 }
  0x4d   : > { %630 = vmatprep.mubr.bf16.mxu0 %v1876_v16 }
  0x54   : > { %1566 = vmatmul.mubr.msk.bf16.gmra.mxu0 %vm512_vm1, %v1661_v24 }
  0x55   : > { %640 = vmatprep.mubr.bf16.mxu0 %v1876_v16 }
  0x5c   : > { %1567 = vmatmul.mubr.msk.bf16.gmra.mxu0 %vm512_vm1, %v1662_v25 }
  0x5d   : > { %650 = vmatprep.mubr.bf16.mxu0 %v1876_v16 }
  0x64   : > { %1568 = vmatmul.mubr.msk.bf16.gmra.mxu0 %vm512_vm1, %v1663_v26 }
  0x65   : > { %660 = vmatprep.mubr.bf16.mxu0 %v1876_v16 }
  0x6c   : > { %1569 = vmatmul.mubr.msk.bf16.gmra.mxu0 %vm512_vm1, %v1664_v27 }
  0x6d   : > { %670 = vmatprep.mubr.bf16.mxu0 %v1876_v16 }
  0x74   : > { %1570 = vmatmul.mubr.msk.bf16.gmra.mxu0 %vm512_vm1, %v1665_v28 }
  0x75   : > { %680 = vmatprep.mubr.bf16.mxu0 %v1876_v16 }
  0x7c   : > { %1571 = vmatmul.mubr.msk.bf16.gmra.mxu0 %vm512_vm1, %v1666_v29 }
  0x7d   : > { %690 = vmatprep.mubr.bf16.mxu0 %v1876_v16 }
  0x84   : > { %1572 = vmatmul.mubr.msk.bf16.gmra.mxu0 %vm512_vm1, %v1667_v30 }
  0x85   : > { %700 = vmatprep.mubr.bf16.mxu0 %v1876_v16 }
  0x8c   : > { %1573 = vmatmul.mubr.msk.bf16.gmra.mxu0 %vm512_vm1, %v1668_v31 }
  0x8d   : > { %710 = vmatprep.mubr.bf16.mxu0 %v1876_v16 }
  0x94   : > { %1574 = vmatmul.mubr.msk.bf16.gmra.mxu0 %vm512_vm1, %v1669_v32 }
  0x95   : > { %720 = vmatprep.mubr.bf16.mxu0 %v1876_v16 }
  0x9c   : > { %1575 = vmatmul.mubr.msk.bf16.gmra.mxu0 %vm512_vm1, %v1670_v33 }
  0x9d   : > { %730 = vmatprep.mubr.bf16.mxu0 %v1876_v16 }
  0xa4   : > { %1576 = vmatmul.mubr.msk.bf16.gmra.mxu0 %vm512_vm1, %v1671_v34 }
  0xa5   : > { %740 = vmatprep.mubr.bf16.mxu0 %v1876_v16 }
  0xac   : > { %1577 = vmatmul.mubr.msk.bf16.gmra.mxu0 %vm512_vm1, %v1672_v35 }
  0xad   : > { %750 = vmatprep.mubr.bf16.mxu0 %v1876_v16 }
  0xb4   : > { %1578 = vmatmul.mubr.msk.bf16.gmra.mxu0 %vm512_vm1, %v1673_v36 }
  0xfc   : > { %v2070_v37 = vpop.f32.mrf.mxu0 }
  0xfd   : > { %2670 = vst [vmem:[#allocation5_spill] sm:$0xff] %v2070_v37 }
  0xfe   : > { %v2072_v38 = vpop.f32.mrf.mxu0 }
 0x100   : > { %v2074_v39 = vpop.f32.mrf.mxu0 }
 0x101   : > { %2671 = vst [vmem:[#allocation6_spill] sm:$0xff] %v2074_v39 }
 0x102   : > { %v2076_v40 = vpop.f32.mrf.mxu0 }
 0x104   : > { %v2078_v41 = vpop.f32.mrf.mxu0 }
 0x105   : > { %v761_v29 = vmax.f32 %v2070_v37, %v2078_v41 }
 0x106   : > { %v2080_v42 = vpop.f32.mrf.mxu0 }
 0x107   : > { %2672 = vst [vmem:[#allocation7_spill] sm:$0xff] %v2080_v42 }
 0x108   : > { %v2082_v43 = vpop.f32.mrf.mxu0 }
 0x109   : > { %2673 = vst [vmem:[#allocation8_spill] sm:$0xff] %v2082_v43  ;;  %v762_v27 = vmax.f32 %v2074_v39, %v2082_v43 }
 0x10a   : > { %v2084_v44 = vpop.f32.mrf.mxu0 }
 0x10b   : > { %2674 = vst [vmem:[#allocation9_spill] sm:$0xff] %v2084_v44  ;;  %v799_v43 = vmax.f32 %v2076_v40, %v2084_v44 }
 0x10c   : > { %v2086_v45 = vpop.f32.mrf.mxu0 }
 0x10d   : > { %v763_v32 = vmax.f32 %v761_v29, %v2086_v45  ;;  %v798_v29 = vmax.f32 %v2072_v38, %v2080_v42 }
 0x10e   : > { %v2088_v46 = vpop.f32.mrf.mxu0 }
 0x110   : > { %v2090_v47 = vpop.f32.mrf.mxu0 }
 0x111   : > { %2675 = vst [vmem:[#allocation10_spill] sm:$0xff] %v2090_v47  ;;  %v764_v30 = vmax.f32 %v762_v27, %v2090_v47 }
 0x112   : > { %v2092_v48 = vpop.f32.mrf.mxu0 }
 0x113   : > { %2676 = vst [vmem:[#allocation11_spill] sm:$0xff] %v2092_v48 }
 0x114   : > { %v2094_v49 = vpop.f32.mrf.mxu0 }
 0x115   : > { %v765_v35 = vmax.f32 %v763_v32, %v2094_v49 }
 0x116   : > { %v2096_v50 = vpop.f32.mrf.mxu0 }
 0x118   : > { %v2098_v51 = vpop.f32.mrf.mxu0 }
 0x119   : > { %2677 = vst [vmem:[#allocation12_spill] sm:$0xff] %v2098_v51  ;;  %v766_v33 = vmax.f32 %v764_v30, %v2098_v51  ;;  %v801_v30 = vmax.f32 %v799_v43, %v2092_v48 }
 0x11a   : > { %v2100_v52 = vpop.f32.mrf.mxu0 }
 0x11b   : > { %v803_v51 = vmax.f32 %v801_v30, %v2100_v52 }
 0x11c   : > { %v2102_v53 = vpop.f32.mrf.mxu0 }
 0x11d   : > { %v767_v37 = vmax.f32 %v765_v35, %v2102_v53 }
 0x11e   : > { %v2104_v54 = vpop.f32.mrf.mxu0 }
 0x120   : > { %v2106_v55 = vpop.f32.mrf.mxu0 }
 0x121   : > { %2678 = vst [vmem:[#allocation13_spill] sm:$0xff] %v2106_v55  ;;  %v768_v36 = vmax.f32 %v766_v33, %v2106_v55  ;;  %v800_v55 = vmax.f32 %v798_v29, %v2088_v46 }
 0x122   : > { %v2108_v56 = vpop.f32.mrf.mxu0 }
 0x123   : > { %v805_v42 = vmax.f32 %v803_v51, %v2108_v56 }
 0x124   : > { %v2110_v57 = vpop.f32.mrf.mxu0 }
 0x125   : > { %v769_v32 = vmax.f32 %v767_v37, %v2110_v57 }
 0x126   : > { %v2112_v58 = vpop.f32.mrf.mxu0 }
 0x128   : > { %v2114_v59 = vpop.f32.mrf.mxu0 }
 0x129   : > { %2679 = vst [vmem:[#allocation14_spill] sm:$0xff] %v2114_v59  ;;  %v770_v27 = vmax.f32 %v768_v36, %v2114_v59  ;;  %v802_v59 = vmax.f32 %v800_v55, %v2096_v50 }
 0x12a   : > { %v2116_v60 = vpop.f32.mrf.mxu0 }
 0x12b   : > { %v807_v29 = vmax.f32 %v805_v42, %v2116_v60 }
 0x12c   : > { %v2118_v61 = vpop.f32.mrf.mxu0 }
 0x12d   : > { %v771_v44 = vmax.f32 %v769_v32, %v2118_v61 }
 0x12e   : > { %v2120_v62 = vpop.f32.mrf.mxu0 }
 0x130   : > { %v2122_v63 = vpop.f32.mrf.mxu0 }
 0x131   : > { %v772_v33 = vmax.f32 %v770_v27, %v2122_v63  ;;  %v804_v27 = vmax.f32 %v802_v59, %v2104_v54 }
 0x132   : > { %v2124_v0 = vpop.f32.mrf.mxu0 }
 0x133   : > { %v809_v55 = vmax.f32 %v807_v29, %v2124_v0 }
 0x134   : > { %v2126_v1 = vpop.f32.mrf.mxu0 }
 0x135   : > { %v773_v43 = vmax.f32 %v771_v44, %v2126_v1 }
 0x136   : > { %v2128_v2 = vpop.f32.mrf.mxu0 }
 0x138   : > { %v2130_v3 = vpop.f32.mrf.mxu0 }
 0x139   : > { %v774_v35 = vmax.f32 %v772_v33, %v2130_v3  ;;  %v806_v33 = vmax.f32 %v804_v27, %v2112_v58 }
 0x13a   : > { %v2132_v4 = vpop.f32.mrf.mxu0 }
 0x13b   : > { %v811_v59 = vmax.f32 %v809_v55, %v2132_v4 }
 0x13c   : > { %v2134_v5 = vpop.f32.mrf.mxu0 }
 0x13d   : > { %2680 = vst [vmem:[#allocation15_spill] sm:$0xff] %v2134_v5  ;;  %v775_v30 = vmax.f32 %v773_v43, %v2134_v5 }
 0x13e   : > { %v2136_v6 = vpop.f32.mrf.mxu0 }
 0x13f   : > { %2681 = vst [vmem:[#allocation16_spill] sm:$0xff] %v2136_v6 }
 0x140   : > { %v2138_v7 = vpop.f32.mrf.mxu0 }
 0x141   : > { %2682 = vst [vmem:[#allocation17_spill] sm:$0xff] %v2138_v7  ;;  %v776_v37 = vmax.f32 %v774_v35, %v2138_v7  ;;  %v808_v35 = vmax.f32 %v806_v33, %v2120_v62 }
 0x142   : > { %v2140_v8 = vpop.f32.mrf.mxu0 }
 0x143   : > { %2683 = vst [vmem:[#allocation18_spill] sm:$0xff] %v2140_v8  ;;  %v813_v27 = vmax.f32 %v811_v59, %v2140_v8 }
 0x144   : > { %v2142_v9 = vpop.f32.mrf.mxu0 }
 0x145   : > { %2684 = vst [vmem:[#allocation19_spill] sm:$0xff] %v2142_v9  ;;  %v777_v51 = vmax.f32 %v775_v30, %v2142_v9 }
 0x146   : > { %v2144_v10 = vpop.f32.mrf.mxu0 }
 0x148   : > { %v2146_v11 = vpop.f32.mrf.mxu0 }
 0x149   : > { %2685 = vst [vmem:[#allocation20_spill] sm:$0xff] %v2146_v11  ;;  %v778_v32 = vmax.f32 %v776_v37, %v2146_v11  ;;  %v810_v37 = vmax.f32 %v808_v35, %v2128_v2 }
 0x14a   : > { %v2148_v12 = vpop.f32.mrf.mxu0 }
 0x14b   : > { %2686 = vst [vmem:[#allocation21_spill] sm:$0xff] %v2148_v12  ;;  %v815_v33 = vmax.f32 %v813_v27, %v2148_v12 }
 0x14c   : > { %v2150_v13 = vpop.f32.mrf.mxu0 }
 0x14d   : > { %2687 = vst [vmem:[#allocation22_spill] sm:$0xff] %v2150_v13  ;;  %v779_v42 = vmax.f32 %v777_v51, %v2150_v13 }
 0x14e   : > { %v2152_v14 = vpop.f32.mrf.mxu0 }
 0x150   : > { %v2154_v15 = vpop.f32.mrf.mxu0 }
 0x151   : > { %2688 = vst [vmem:[#allocation23_spill] sm:$0xff] %v2154_v15  ;;  %v780_v44 = vmax.f32 %v778_v32, %v2154_v15  ;;  %v812_v32 = vmax.f32 %v810_v37, %v2136_v6 }
 0x152   : > { %v2156_v16 = vpop.f32.mrf.mxu0 }
 0x153   : > { %v814_v5 = vmax.f32 %v812_v32, %v2144_v10  ;;  %v817_v35 = vmax.f32 %v815_v33, %v2156_v16 }
 0x154   : > { %v2158_v17 = vpop.f32.mrf.mxu0 }
 0x155   : > { %v781_v29 = vmax.f32 %v779_v42, %v2158_v17 }
 0x156   : > { %v2160_v18 = vpop.f32.mrf.mxu0 }
 0x158   : > { %v2162_v19 = vpop.f32.mrf.mxu0 }
 0x159   : > { %v782_v43 = vmax.f32 %v780_v44, %v2162_v19 }
 0x15a   : > { %v2164_v20 = vpop.f32.mrf.mxu0 }
 0x15b   : > { %v819_v37 = vmax.f32 %v817_v35, %v2164_v20 }
 0x15c   : > { %v2166_v21 = vpop.f32.mrf.mxu0 }
 0x15d   : > { %v783_v55 = vmax.f32 %v781_v29, %v2166_v21 }
 0x15e   : > { %v2168_v22 = vpop.f32.mrf.mxu0 }
 0x160   : > { %v2170_v23 = vpop.f32.mrf.mxu0 }
 0x161   : > { %v784_v30 = vmax.f32 %v782_v43, %v2170_v23  ;;  %v816_v43 = vmax.f32 %v814_v5, %v2152_v14 }
 0x162   : > { %v2172_v24 = vpop.f32.mrf.mxu0 }
 0x163   : > { %v821_v8 = vmax.f32 %v819_v37, %v2172_v24 }
 0x164   : > { %v2174_v25 = vpop.f32.mrf.mxu0 }
 0x165   : > { %v785_v59 = vmax.f32 %v783_v55, %v2174_v25 }
 0x166   : > { %v2176_v26 = vpop.f32.mrf.mxu0 }
 0x168   : > { %v2180_v28 = vpop.f32.mrf.mxu0 }
 0x169   : > { %v786_v51 = vmax.f32 %v784_v30, %v2180_v28  ;;  %v818_v30 = vmax.f32 %v816_v43, %v2160_v18 }
 0x16a   : > { %v2185_v31 = vpop.f32.mrf.mxu0 }
 0x16b   : > { %v820_v33 = vmax.f32 %v818_v30, %v2168_v22  ;;  %v823_v55 = vmax.f32 %v821_v8, %v2185_v31 }
 0x16c   : > { %v2189_v34 = vpop.f32.mrf.mxu0 }
 0x16d   : > { %v787_v27 = vmax.f32 %v785_v59, %v2189_v34  ;;  %v822_v5 = vmax.f32 %v820_v33, %v2176_v26 }
 0x16e   : > { %v2193_v39 = vpop.f32.mrf.mxu0 }
 0x16f   : > { %v824_v59 = vmax.f32 %v822_v5, %v2193_v39  ;;  %v2689_v5 = vld [vmem:[#allocation8_spill] sm:$0xff] }
 0x170   : > { %v2199_v47 = vpop.f32.mrf.mxu0 }
 0x171   : > { %v788_v42 = vmax.f32 %v786_v51, %v2199_v47  ;;  %v1676_v51 = vld [vmem:[%s2025_s12 + $0x4] ss:$8 sps:$4 sm:$0xff]  }
 0x172   : > { %v2210_v36 = vpop.f32.mrf.mxu0  ;;  %1147 = vmatprep.mubr.bf16.mxu1 %v1676_v51 }
 0x173   : > { %v825_v35 = vmax.f32 %v823_v55, %v2210_v36 }
 0x174   : > { %v2220_v48 = vpop.f32.mrf.mxu0 }
 0x175   : > { %v789_v32 = vmax.f32 %v787_v27, %v2220_v48 }
 0x176   : > { %v2230_v7 = vpop.f32.mrf.mxu0 }
 0x177   : > { %v826_v37 = vmax.f32 %v824_v59, %v2230_v7  ;;  %v2690_v59 = vld [vmem:[#allocation10_spill] sm:$0xff] }
 0x178   : > { %v2240_v44 = vpop.f32.mrf.mxu0 }
 0x179   : > { %v790_v29 = vmax.f32 %v788_v42, %v2240_v44 }
 0x17a   : > { %v2256_v9 = vpop.f32.mrf.mxu0 }
 0x17b   : > { %v791_v11 = vmax.f32 %v789_v32, %v790_v29  ;;  %v827_v43 = vmax.f32 %v825_v35, %v2256_v9 }
 0x17d   : > { %v792_v42 = vrot.slane %v791_v11, 4  ;;  %v828_v30 = vmax.f32 %v826_v37, %v827_v43 }
 0x17f   : > { %v793_v27 = vmax.f32 %v791_v11, %v792_v42  ;;  %v829_v8 = vrot.slane %v828_v30, 4 }
 0x181   : > { %v794_v6 = vrot.slane %v793_v27, 2  ;;  %v830_v32 = vmax.f32 %v828_v30, %v829_v8  ;;  %v2692_v8 = vld [vmem:[#allocation13_spill] sm:$0xff] }
 0x183   : > { %v795_v29 = vmax.f32 %v793_v27, %v794_v6  ;;  %v831_v15 = vrot.slane %v830_v32, 2 }
 0x185   : > { %v796_v12 = vrot.slane %v795_v29, 1  ;;  %v832_v33 = vmax.f32 %v830_v32, %v831_v15  ;;  %v2691_v15 = vld [vmem:[#allocation12_spill] sm:$0xff] }
 0x187   : > { %v2263_v13 = vmax.f32 %v795_v29, %v796_v12  ;;  %v833_v51 = vrot.slane %v832_v33, 1 }
 0x189   : > { %v839_v55 = vsub.f32 %v2078_v41, %v2263_v13  ;;  %v841_v35 = vsub.f32 %v2689_v5, %v2263_v13  ;;  %v843_v11 = vsub.f32 %v2086_v45, %v2263_v13  ;;  %v845_v42 = vsub.f32 %v2690_v59, %v2263_v13 }
 0x18a   : > { %v847_v6 = vsub.f32 %v2094_v49, %v2263_v13  ;;  %v2275_v43 = vmax.f32 %v832_v33, %v833_v51  ;;  %v849_v37 = vsub.f32 %v2691_v15, %v2263_v13  ;;  %v851_v27 = vsub.f32 %v2102_v53, %v2263_v13 }
 0x18b   : > { %v907_v12 = vmul.f32 1.442695, %v839_v55  ;;  %v911_v41 = vmul.f32 1.442695, %v841_v35  ;;  %v915_v30 = vmul.f32 1.442695, %v843_v11  ;;  %v853_v45 = vsub.f32 %v2692_v8, %v2263_v13 }
 0x18c   : > { %v919_v29 = vmul.f32 1.442695, %v845_v42  ;;  %v836_v32 = vsub.f32 %v2072_v38, %v2275_v43  ;;  %v923_v5 = vmul.f32 1.442695, %v847_v6  ;;  %v838_v49 = vsub.f32 %v2076_v40, %v2275_v43  ;;  %v1224_v38 = vld [vmem:[%s2647_s4 + $0x10] sm:$0xff]  ;;  %v1222_v40 = vld [vmem:[%s2647_s4] sm:$0xff] }
 0x18d   : > { %1688 = vpow2.f32 %v907_v12  ;;  %v927_v33 = vmul.f32 1.442695, %v849_v37  ;;  %v860_v55 = vsub.f32 %v2120_v62, %v2275_v43  ;;  %v931_v51 = vmul.f32 1.442695, %v851_v27  ;;  %1242 = vperm.xlu1 %1655, %v1224_v38   ;;  %1232 = vperm.xlu0 %1654, %v1222_v40   ;;  %v1225_v42 = vld [vmem:[%s2647_s4 + $0x18] sm:$0xff]  ;;  %v1223_v6 = vld [vmem:[%s2647_s4 + $0x8] sm:$0xff] }
 0x18e   : > { %1690 = vpow2.f32 %v911_v41  ;;  %v862_v53 = vsub.f32 %v2124_v0, %v2275_v43  ;;  %v935_v35 = vmul.f32 1.442695, %v853_v45  ;;  %v863_v11 = vsub.f32 %v2126_v1, %v2263_v13 }
 0x18f   : > { %1692 = vpow2.f32 %v915_v30  ;;  %v901_v59 = vmul.f32 1.442695, %v836_v32  ;;  %v864_v62 = vsub.f32 %v2128_v2, %v2275_v43  ;;  %v905_v0 = vmul.f32 1.442695, %v838_v49 }
 0x190   : > { %1694 = vpow2.f32 %v919_v29  ;;  %v865_v1 = vsub.f32 %v2130_v3, %v2263_v13  ;;  %v949_v12 = vmul.f32 1.442695, %v860_v55  ;;  %v866_v15 = vsub.f32 %v2132_v4, %v2275_v43  ;;  %v1227_v3 = vld [vmem:[%s2647_s4 + $0x28] sm:$0xff]  ;;  %v1226_v4 = vld [vmem:[%s2647_s4 + $0x20] sm:$0xff] }
 0x191   : > { %1696 = vpow2.f32 %v923_v5  ;;  %v953_v2 = vmul.f32 1.442695, %v862_v53  ;;  %v856_v37 = vsub.f32 %v2112_v58, %v2275_v43  ;;  %v955_v41 = vmul.f32 1.442695, %v863_v11  ;;  %1247 = vperm.xlu1 %1655, %v1225_v42   ;;  %1237 = vperm.xlu0 %1654, %v1223_v6   ;;  %v2693_v55 = vld [vmem:[#allocation14_spill] sm:$0xff]  ;;  %v2694_v11 = vld [vmem:[#allocation7_spill] sm:$0xff] }
 0x192   : > { %1698 = vpow2.f32 %v927_v33  ;;  %v859_v27 = vsub.f32 %v2118_v61, %v2263_v13  ;;  %v957_v30 = vmul.f32 1.442695, %v864_v62  ;;  %v861_v58 = vsub.f32 %v2122_v63, %v2263_v13  ;;  %v1228_v33 = vld [vmem:[%s2647_s4 + $0x30] sm:$0xff]  ;;  %v2695_v42 = vld [vmem:[#allocation9_spill] sm:$0xff] }
 0x193   : > { %1700 = vpow2.f32 %v931_v51  ;;  %v959_v8 = vmul.f32 1.442695, %v865_v1  ;;  %v858_v45 = vsub.f32 %v2116_v60, %v2275_v43  ;;  %v961_v61 = vmul.f32 1.442695, %v866_v15  ;;  %v1229_v60 = vld [vmem:[%s2647_s4 + $0x38] sm:$0xff] }
 0x194   : > { %1702 = vpow2.f32 %v935_v35  ;;  %v852_v29 = vsub.f32 %v2104_v54, %v2275_v43  ;;  %v941_v32 = vmul.f32 1.442695, %v856_v37  ;;  %v855_v49 = vsub.f32 %v2110_v57, %v2263_v13 }
 0x195   : > { %1704 = vpow2.f32 %v901_v59  ;;  %1257 = vperm.xlu1 %1655, %v1227_v3   ;;  %1252 = vperm.xlu0 %1654, %v1226_v4   ;;  %v947_v63 = vmul.f32 1.442695, %v859_v27  ;;  %v857_v51 = vsub.f32 %v2693_v55, %v2263_v13  ;;  %v951_v53 = vmul.f32 1.442695, %v861_v58 }
 0x196   : > { %1706 = vpow2.f32 %v905_v0  ;;  %v854_v57 = vsub.f32 %v2108_v56, %v2275_v43  ;;  %v945_v38 = vmul.f32 1.442695, %v858_v45  ;;  %v840_v59 = vsub.f32 %v2694_v11, %v2275_v43 }
 0x197   : > { %1708 = vpow2.f32 %v949_v12  ;;  %v933_v62 = vmul.f32 1.442695, %v852_v29  ;;  %v842_v6 = vsub.f32 %v2695_v42, %v2275_v43  ;;  %v939_v1 = vmul.f32 1.442695, %v855_v49  ;;  %v2696_v29 = vld [vmem:[#allocation11_spill] sm:$0xff] }
 0x198   : > { %1710 = vpow2.f32 %v953_v2  ;;  %v848_v56 = vsub.f32 %v2096_v50, %v2275_v43  ;;  %v943_v15 = vmul.f32 1.442695, %v857_v51  ;;  %v850_v37 = vsub.f32 %v2100_v52, %v2275_v43 }
 0x199   : > { %1712 = vpow2.f32 %v955_v41  ;;  %1267 = vperm.xlu1 %1655, %v1229_v60   ;;  %1262 = vperm.xlu0 %1654, %v1228_v33   ;;  %v937_v41 = vmul.f32 1.442695, %v854_v57  ;;  %v909_v3 = vmul.f32 1.442695, %v840_v59  ;;  %v844_v50 = vsub.f32 %v2088_v46, %v2275_v43 }
 0x19a   : > { %v2327_v5 = vpop.eup %1688  ;;  %1714 = vpow2.f32 %v957_v30  ;;  %v879_v30 = vsub.f32 %v2158_v17, %v2263_v13  ;;  %v913_v58 = vmul.f32 1.442695, %v842_v6  ;;  %v881_v52 = vsub.f32 %v2162_v19, %v2263_v13 }
 0x19b   : > { %v2337_v54 = vpop.eup %1690  ;;  %1716 = vpow2.f32 %v959_v8  ;;  %v925_v45 = vmul.f32 1.442695, %v848_v56  ;;  %v846_v17 = vsub.f32 %v2696_v29, %v2275_v43  ;;  %v884_v33 = vsub.f32 %v2168_v22, %v2275_v43 }
 0x19c   : > { %v2341_v35 = vpop.eup %1692  ;;  %1718 = vpow2.f32 %v961_v61  ;;  %v987_v46 = vmul.f32 1.442695, %v879_v30  ;;  %v917_v19 = vmul.f32 1.442695, %v844_v50  ;;  %v885_v51 = vsub.f32 %v2170_v23, %v2263_v13 }
 0x19d   : > { %v2345_v40 = vpop.eup %1694  ;;  %1720 = vpow2.f32 %v941_v32  ;;  %v929_v32 = vmul.f32 1.442695, %v850_v37  ;;  %v921_v11 = vmul.f32 1.442695, %v846_v17  ;;  %v887_v59 = vsub.f32 %v2174_v25, %v2263_v13 }
 0x19e   : > { %v2349_v0 = vpop.eup %1696  ;;  %1722 = vpow2.f32 %v947_v63  ;;  %v883_v63 = vsub.f32 %v2166_v21, %v2263_v13  ;;  %v888_v42 = vsub.f32 %v2176_v26, %v2275_v43  ;;  %v997_v23 = vmul.f32 1.442695, %v884_v33 }
 0x19f   : > { %v2353_v12 = vpop.eup %1698  ;;  %1724 = vpow2.f32 %v951_v53  ;;  %v991_v53 = vmul.f32 1.442695, %v881_v52  ;;  %v889_v56 = vsub.f32 %v2180_v28, %v2263_v13  ;;  %v890_v25 = vsub.f32 %v2185_v31, %v2275_v43  ;;  %v2697_v28 = vld [vmem:[#allocation5_spill] sm:$0xff]  ;;  %v2698_v31 = vld [vmem:[#allocation6_spill] sm:$0xff] }
 0x1a0   : > { %v2357_v2 = vpop.eup %1700  ;;  %1726 = vpow2.f32 %v945_v38  ;;  %v886_v38 = vsub.f32 %v2172_v24, %v2275_v43  ;;  %v999_v24 = vmul.f32 1.442695, %v885_v51  ;;  %v897_v26 = vsub.f32 %v2240_v44, %v2263_v13 }
 0x1a1   : > { %v2361_v27 = vpop.eup %1702  ;;  %1728 = vpow2.f32 %v933_v62  ;;  %v995_v62 = vmul.f32 1.442695, %v883_v63  ;;  %v1003_v50 = vmul.f32 1.442695, %v887_v59  ;;  %v835_v52 = vsub.f32 %v2697_v28, %v2263_v13 }
 0x1a2   : > { %v2365_v4 = vpop.eup %1704  ;;  %1730 = vpow2.f32 %v939_v1  ;;  %v837_v17 = vsub.f32 %v2698_v31, %v2263_v13  ;;  %v898_v44 = vsub.f32 %v2256_v9, %v2275_v43  ;;  %v1009_v63 = vmul.f32 1.442695, %v890_v25 }
 0x1a3   : > { %v2369_v8 = vpop.eup %1706  ;;  %1732 = vpow2.f32 %v943_v15  ;;  %v1023_v33 = vmul.f32 1.442695, %v897_v26  ;;  %v896_v51 = vsub.f32 %v2230_v7, %v2275_v43  ;;  %v895_v9 = vsub.f32 %v2220_v48, %v2263_v13 }
 0x1a4   : > { %v1709_v61 = vpop.eup %1708  ;;  %1734 = vpow2.f32 %v937_v41  ;;  %v1001_v41 = vmul.f32 1.442695, %v886_v38  ;;  %v903_v38 = vmul.f32 1.442695, %v837_v17  ;;  %v1025_v59 = vmul.f32 1.442695, %v898_v44 }
 0x1a5   : > { %v1711_v49 = vpop.eup %1710  ;;  %1736 = vpow2.f32 %v909_v3  ;;  %v1021_v48 = vmul.f32 1.442695, %v896_v51  ;;  %v882_v31 = vsub.f32 %v2164_v20, %v2275_v43  ;;  %v1029_v20 = vpack.c.bf16 %v2337_v54, %v2327_v5  ;;  %v2700_v5 = vld [vmem:[#allocation23_spill] sm:$0xff] }
 0x1a6   : > { %v1713_v60 = vpop.eup %1712  ;;  %1738 = vpow2.f32 %v913_v58  ;;  %v1040_v30 = vpack.c.bf16 %v1711_v49, %v1709_v61  ;;  %v877_v54 = vsub.f32 %v2700_v5, %v2263_v13  ;;  %v1067_v5 = vld [vmem:[%s2025_s12 + $0x40] sm:$0x11] }
 0x1a7   : > { %v1715_v55 = vpop.eup %1714  ;;  %1740 = vpow2.f32 %v925_v45  ;;  %v1005_v45 = vmul.f32 1.442695, %v888_v42 }
 0x1a8   : > { %v1717_v57 = vpop.eup %1716  ;;  %1742 = vpow2.f32 %v929_v32  ;;  %v1007_v32 = vmul.f32 1.442695, %v889_v56  ;;  %v1019_v56 = vmul.f32 1.442695, %v895_v9 }
 0x1a9   : > { %v1719_v21 = vpop.eup %1718  ;;  %1744 = vpow2.f32 %v987_v46  ;;  %v1041_v15 = vpack.c.bf16 %v1717_v57, %v1713_v60 }
 0x1aa   : > { %v1721_v22 = vpop.eup %1720  ;;  %1746 = vpow2.f32 %v917_v19  ;;  %v1042_v6 = vpack.c.bf16 %v1719_v21, %v1715_v55  ;;  %v892_v19 = vsub.f32 %v2193_v39, %v2275_v43  ;;  %v894_v39 = vsub.f32 %v2210_v36, %v2275_v43 }
 0x1ab   : > { %v1723_v1 = vpop.eup %1722  ;;  %1748 = vpow2.f32 %v991_v53  ;;  %v899_v53 = vmul.f32 1.442695, %v835_v52  ;;  %v1035_v36 = vpack.c.bf16 %v2361_v27, %v2357_v2  ;;  %v1033_v2 = vpack.c.bf16 %v2353_v12, %v2349_v0 }
 0x1ac   : > { %v1725_v37 = vpop.eup %1724  ;;  %1750 = vpow2.f32 %v921_v11  ;;  %1115 = vmatprep.subr.bf16.mxu1 %v1042_v6  ;;  %v1013_v7 = vmul.f32 1.442695, %v892_v19  ;;  %v880_v0 = vsub.f32 %v2160_v18, %v2275_v43  ;;  %v1031_v12 = vpack.c.bf16 %v2345_v40, %v2341_v35 }
 0x1ad   : > { %v1727_v3 = vpop.eup %1726  ;;  %1752 = vpow2.f32 %v995_v62  ;;  %1116 = vmatpush1.bf16.msra.mxu1 %v1041_v15  ;;  %v1039_v61 = vpack.c.bf16 %v1725_v37, %v1723_v1  ;;  %v893_v1 = vsub.f32 %v2199_v47, %v2263_v13  ;;  %v1017_v15 = vmul.f32 1.442695, %v894_v39 }
 0x1ae   : > { %v1729_v58 = vpop.eup %1728  ;;  %1754 = vpow2.f32 %v997_v23  ;;  %1117 = vmatprep.subr.bf16.mxu1 %v1040_v30  ;;  %v1038_v46 = vpack.c.bf16 %v1727_v3, %v1721_v22  ;;  %v891_v23 = vsub.f32 %v2189_v34, %v2263_v13  ;;  %v876_v35 = vsub.f32 %v2152_v14, %v2275_v43  ;;  %v2699_v14 = vld [vmem:[#allocation22_spill] sm:$0xff] }
 0x1af   : > { %v1731_v29 = vpop.eup %1730  ;;  %1756 = vpow2.f32 %v999_v24  ;;  %v1015_v3 = vmul.f32 1.442695, %v893_v1  ;;  %v989_v40 = vmul.f32 1.442695, %v880_v0 }
 0x1b0   : > { %v1733_v49 = vpop.eup %1732  ;;  %1758 = vpow2.f32 %v1001_v41  ;;  %v1011_v30 = vmul.f32 1.442695, %v891_v23  ;;  %v981_v9 = vmul.f32 1.442695, %v876_v35 }
 0x1b1   : > { %v1735_v60 = vpop.eup %1734  ;;  %1760 = vpow2.f32 %v1003_v50  ;;  %1118 = vmatpush1.bf16.msra.mxu1 %v1039_v61  ;;  %v1037_v11 = vpack.c.bf16 %v1733_v49, %v1731_v29 }
 0x1b2   : > { %v2401_v55 = vpop.eup %1736  ;;  %1762 = vpow2.f32 %v1005_v45  ;;  %1119 = vmatprep.subr.bf16.mxu1 %v1038_v46  ;;  %v1036_v62 = vpack.c.bf16 %v1735_v60, %v1729_v58  ;;  %v878_v46 = vsub.f32 %v2156_v16, %v2275_v43  ;;  %v993_v60 = vmul.f32 1.442695, %v882_v31 }
 0x1b3   : > { %v1739_v57 = vpop.eup %1738  ;;  %1764 = vpow2.f32 %v1007_v32 }
 0x1b4   : > { %v1741_v21 = vpop.eup %1740  ;;  %1766 = vpow2.f32 %v1009_v63  ;;  %v1030_v17 = vpack.c.bf16 %v1739_v57, %v2401_v55  ;;  %v872_v55 = vsub.f32 %v2144_v10, %v2275_v43 }
 0x1b5   : > { %v1743_v22 = vpop.eup %1742  ;;  %1768 = vpow2.f32 %v1023_v33  ;;  %1120 = vmatpush1.bf16.msra.mxu1 %v1037_v11  ;;  %v1028_v33 = vpack.c.bf16 %v2369_v8, %v2365_v4  ;;  %v2701_v4 = vld [vmem:[#allocation21_spill] sm:$0xff]  ;;  %v985_v11 = vmul.f32 1.442695, %v878_v46 }
 0x1b6   : > { %v2409_v42 = vpop.eup %1744  ;;  %1770 = vpow2.f32 %v899_v53  ;;  %1121 = vmatprep.subr.bf16.mxu1 %v1036_v62  ;;  %v1034_v37 = vpack.c.bf16 %v1743_v22, %v1741_v21  ;;  %v875_v53 = vsub.f32 %v2699_v14, %v2263_v13  ;;  %v874_v8 = vsub.f32 %v2701_v4, %v2275_v43  ;;  %v2703_v22 = vld [vmem:[#allocation19_spill] sm:$0xff]  ;;  %v1680_v14 = vld [vmem:[%s2025_s12 + $0x24] ss:$8 sps:$4 sm:$0xff]  }
 0x1b7   : > { %v1747_v6 = vpop.eup %1746  ;;  %1772 = vpow2.f32 %v903_v38  ;;  %v973_v62 = vmul.f32 1.442695, %v872_v55  ;;  %v1677_v55 = vld [vmem:[%s2025_s12 + $0x14] ss:$8 sps:$4 sm:$0xff]  }
 0x1b8   : > { %v2417_v24 = vpop.eup %1748  ;;  %1774 = vpow2.f32 %v1025_v59  ;;  %v2702_v59 = vld [vmem:[#allocation16_spill] sm:$0xff]  ;;  %v979_v23 = vmul.f32 1.442695, %v875_v53  ;;  %v1682_v53 = vld [vmem:[%s2025_s12 + $0x20] ss:$8 sps:$4 sm:$0xff]  }
 0x1b9   : > { %v1751_v25 = vpop.eup %1750  ;;  %1776 = vpow2.f32 %v1013_v7  ;;  %1122 = vmatpush1.bf16.msra.mxu1 %v1035_v36  ;;  %v1049_v34 = vpack.c.bf16 %v2417_v24, %v2409_v42  ;;  %v868_v39 = vsub.f32 %v2702_v59, %v2275_v43  ;;  %v871_v7 = vsub.f32 %v2703_v22, %v2263_v13 }
 0x1ba   : > { %v2421_v41 = vpop.eup %1752  ;;  %1778 = vpow2.f32 %v1021_v48  ;;  %1123 = vmatprep.subr.bf16.mxu1 %v1034_v37  ;;  %v1032_v26 = vpack.c.bf16 %v1751_v25, %v1747_v6  ;;  %v2704_v6 = vld [vmem:[#allocation20_spill] sm:$0xff]  ;;  %v2705_v37 = vld [vmem:[#allocation18_spill] sm:$0xff] }
 0x1bb   : > { %v2423_v47 = vpop.eup %1754  ;;  %1780 = vpow2.f32 %v1019_v56  ;;  %v873_v1 = vsub.f32 %v2704_v6, %v2263_v13  ;;  %v983_v56 = vmul.f32 1.442695, %v877_v54  ;;  %v870_v25 = vsub.f32 %v2705_v37, %v2275_v43  ;;  %v1685_v54 = vld [vmem:[%s2025_s12 + $0x30] ss:$8 sps:$4 sm:$0xff]  }
 0x1bc   : > { %v2427_v27 = vpop.eup %1756  ;;  %1782 = vpow2.f32 %v1017_v15  ;;  %v971_v0 = vmul.f32 1.442695, %v871_v7  ;;  %v1198_v37 = vlaneseq }
 0x1bd   : > { %v2429_v50 = vpop.eup %1758  ;;  %1124 = vmatpush1.bf16.msra.mxu1 %v1033_v2  ;;  %v1051_v58 = vpack.c.bf16 %v2427_v27, %v2421_v41  ;;  %1784 = vpow2.f32 %v1011_v30  ;;  %v977_v30 = vmul.f32 1.442695, %v874_v8  ;;  %v965_v2 = vmul.f32 1.442695, %v868_v39 }
 0x1be   : > { %v2433_v28 = vpop.eup %1760  ;;  %1125 = vmatprep.subr.bf16.mxu1 %v1032_v26  ;;  %v1052_v52 = vpack.c.bf16 %v2429_v50, %v2423_v47  ;;  %1786 = vpow2.f32 %v1015_v3  ;;  %v2706_v26 = vld [vmem:[#allocation15_spill] sm:$0xff] }
 0x1bf   : > { %v2437_v45 = vpop.eup %1762  ;;  %1788 = vpow2.f32 %v989_v40 }
 0x1c0   : > { %v2443_v29 = vpop.eup %1764  ;;  %1790 = vpow2.f32 %v993_v60 }
 0x1c1   : > { %v2448_v32 = vpop.eup %1766  ;;  %1126 = vmatpush1.bf16.msra.mxu1 %v1031_v12  ;;  %v1053_v61 = vpack.c.bf16 %v2443_v29, %v2433_v28  ;;  %1792 = vpow2.f32 %v981_v9  ;;  %v2707_v12 = vld [vmem:[#allocation17_spill] sm:$0xff]  ;;  %v1588_v9 = vcombine.high %v1067_v5, %v1067_v5 }
 0x1c2   : > { %v1769_v49 = vpop.eup %1768  ;;  %1127 = vmatprep.subr.bf16.mxu1 %v1030_v17  ;;  %v1054_v18 = vpack.c.bf16 %v2448_v32, %v2437_v45  ;;  %1794 = vpow2.f32 %v985_v11  ;;  %v867_v45 = vsub.f32 %v2706_v26, %v2263_v13  ;;  %v869_v31 = vsub.f32 %v2707_v12, %v2263_v13 }
 0x1c3   : > { %v1771_v44 = vpop.eup %1770  ;;  %1796 = vpow2.f32 %v973_v62  ;;  %v975_v17 = vmul.f32 1.442695, %v873_v1 }
 0x1c4   : > { %v1773_v63 = vpop.eup %1772  ;;  %1798 = vpow2.f32 %v979_v23  ;;  %v963_v43 = vmul.f32 1.442695, %v867_v45 }
 0x1c5   : > { %v1775_v19 = vpop.eup %1774  ;;  %1128 = vmatpush1.bf16.msra.mxu1 %v1029_v20  ;;  %v1027_v16 = vpack.c.bf16 %v1773_v63, %v1771_v44  ;;  %1800 = vpow2.f32 %v983_v56  ;;  %v967_v44 = vmul.f32 1.442695, %v869_v31 }
 0x1c6   : > { %v1777_v51 = vpop.eup %1776  ;;  %1129 = vmatprep.subr.bf16.mxu1 %v1028_v33  ;;  %1802 = vpow2.f32 %v977_v30 }
 0x1c7   : > { %v1779_v57 = vpop.eup %1778  ;;  %1804 = vpow2.f32 %v965_v2 }
 0x1c8   : > { %v1781_v38 = vpop.eup %1780  ;;  %v1058_v10 = vpack.c.bf16 %v1775_v19, %v1779_v57  ;;  %1806 = vpow2.f32 %v971_v0  ;;  %v1683_v57 = vld [vmem:[%s2025_s12 + $0x34] ss:$8 sps:$4 sm:$0xff]  }
 0x1c9   : > { %v1783_v21 = vpop.eup %1782  ;;  %1130 = vmatpush1.bf16.msra.mxu1 %v1027_v16  ;;  %v1057_v36 = vpack.c.bf16 %v1769_v49, %v1781_v38  ;;  %v969_v49 = vmul.f32 1.442695, %v870_v25  ;;  %1808 = vpow2.f32 %v975_v17  ;;  %v1587_v16 = vcombine.low %v1067_v5, %v1067_v5  ;;  %v1287_v5 = vld [vmem:[%s2531_s23 + $0x8] sm:$0xff] }
 0x1ca   : > { %1131 = vmatprep.subr.bf16.mxu1 %v1058_v10  ;;  %v1785_v48 = vpop.eup %1784  ;;  %v1056_v3 = vpack.c.bf16 %v1783_v21, %v1777_v51  ;;  %v1679_v51 = vld [vmem:[%s2025_s12 + $0x10] ss:$8 sps:$4 sm:$0xff]  }
 0x1cb   : > { %v1787_v15 = vpop.eup %1786  ;;  %1810 = vpow2.f32 %v969_v49 }
 0x1cc   : > { %v1055_v32 = vpack.c.bf16 %v1787_v15, %v1785_v48  ;;  %v1789_v35 = vpop.eup %1788  ;;  %1812 = vpow2.f32 %v963_v43 }
 0x1cd   : > { %1132 = vmatpush2.bf16.msra.mxu1 %v1057_v36  ;;  %v1791_v40 = vpop.eup %1790  ;;  %1814 = vpow2.f32 %v967_v44 }
 0x1ce   : > { %1133 = vmatprep.subr.bf16.mxu1 %v1056_v3  ;;  %v1793_v13 = vpop.eup %1792  ;;  %v1050_v20 = vpack.c.bf16 %v1791_v40, %v1789_v35  ;;  %v1199_v3 = vshrl.u32 %v1198_v37, 7 }
 0x1cf   : > { %v1795_v63 = vpop.eup %1794 }
 0x1d0   : > { %v1048_v33 = vpack.c.bf16 %v1795_v63, %v1793_v13  ;;  %v1200_v45 = vsub.s32 0, %v1199_v3 }
 0x1d1   : > { %1134 = vmatpush2.bf16.msra.mxu1 %v1055_v32 }
 0x1d2   : > { %1135 = vmatprep.subr.bf16.mxu1 %v1054_v18  ;;  %v1797_v18 = vpop.eup %1796 }
 0x1d3   : > { %v1799_v46 = vpop.eup %1798 }
 0x1d4   : > { %v1801_v60 = vpop.eup %1800 }
 0x1d5   : > { %1136 = vmatpush2.bf16.msra.mxu1 %v1053_v61  ;;  %v1803_v28 = vpop.eup %1802 }
 0x1d6   : > { %1137 = vmatprep.subr.bf16.mxu1 %v1052_v52  ;;  %v1805_v47 = vpop.eup %1804  ;;  %v1047_v52 = vpack.c.bf16 %v1801_v60, %v1799_v46  ;;  %v1046_v61 = vpack.c.bf16 %v1803_v28, %v1797_v18 }
 0x1d7   : > { %v1807_v50 = vpop.eup %1806 }
 0x1d8   : > { %v1809_v29 = vpop.eup %1808 }
 0x1d9   : > { %1138 = vmatpush2.bf16.msra.mxu1 %v1051_v58  ;;  %v1811_v41 = vpop.eup %1810  ;;  %v1045_v58 = vpack.c.bf16 %v1809_v29, %v1807_v50  ;;  %v1288_v50 = vld [vmem:[%s2531_s23 + $0x10] sm:$0xff] }
 0x1da   : > { %1139 = vmatprep.subr.bf16.mxu1 %v1050_v20  ;;  %v1813_v27 = vpop.eup %1812  ;;  %v1044_v42 = vpack.c.bf16 %v1811_v41, %v1805_v47  ;;  %v1286_v47 = vld [vmem:[%s2531_s23] sm:$0xff]  ;;  %v1292_v29 = vld [vmem:[%s2531_s23 + $0x30] sm:$0xff] }
 0x1db   : > { %v1815_v19 = vpop.eup %1814 }
 0x1dc   : > { %v1043_v24 = vpack.c.bf16 %v1815_v19, %v1813_v27 }
 0x1dd   : > { %1140 = vmatpush2.bf16.msra.mxu1 %v1049_v34  ;;  %v1674_v34 = vld [vmem:[%s2025_s12] ss:$8 sps:$4 sm:$0xff]   ;;  %s1302_s12 = sld [smem:[#allocation2]] }
 0x1de   : > { %1141 = vmatprep.subr.bf16.mxu1 %v1048_v33 }
 0x1e1   : > { %1142 = vmatpush2.bf16.msra.mxu1 %v1047_v52  ;;  %v1290_v52 = vld [vmem:[%s2531_s23 + $0x20] sm:$0xff] }
 0x1e2   : > { %1143 = vmatprep.subr.bf16.mxu1 %v1046_v61 }
 0x1e3   : > { %v2517_v32 = vstv %s1302_s12 }
 0x1e5   : > { %1144 = vmatpush2.bf16.msra.mxu1 %v1045_v58 }
 0x1e6   : > { %1145 = vmatprep.subr.bf16.mxu1 %v1044_v42 }
 0x1e9   : > { %1146 = vmatpush2.bf16.msra.mxu1 %v1043_v24 }
 0x1ec   : > { %1148 = vmatmul.mubr.bf16.vlgmr.msra.gmra.mxu1 %v1674_v34 }
 0x1ed   : > { %1157 = vmatprep.mubr.bf16.mxu1 %v1677_v55 }
 0x1f4   : > { %1158 = vmatmul.mubr.bf16.gmra.mxu1 %v1679_v51 }
 0x1f5   : > { %1167 = vmatprep.mubr.bf16.mxu1 %v1680_v14 }
 0x1fc   : > { %1168 = vmatmul.mubr.bf16.gmra.mxu1 %v1682_v53 }
 0x1fd   : > { %1177 = vmatprep.mubr.bf16.mxu1 %v1683_v57 }
 0x204   : > { %1178 = vmatmul.mubr.bf16.gmra.mxu1 %v1685_v54 }
 0x205   : > { %1187 = vmatprep.mubr.bf16.mxu1 %v1588_v9 }
 0x208   : > { %v1243_v2 = vpop.permute.xlu1 %1242  ;;  %v1233_v26 = vpop.permute.xlu0 %1232 }
 0x20c   : > { %1188 = vmatmul.mubr.bf16.gmra.mxu1 %v1587_v16  ;;  %v1248_v12 = vpop.permute.xlu1 %1247  ;;  %v1238_v49 = vpop.permute.xlu0 %1237 }
 0x210   : > { %v1258_v55 = vpop.permute.xlu1 %1257 }
 0x2ac   : > { %v1149_v38 = vpop.f32.mrf.mxu1 }
 0x2ae   : > { %v1151_v4 = vpop.f32.mrf.mxu1 }
 0x2b0   : > { %v1153_v8 = vpop.f32.mrf.mxu1 }
 0x2b2   : > { %v1155_v11 = vpop.f32.mrf.mxu1 }
 0x2b4   : > { %v1159_v10 = vpop.f32.mrf.mxu1 }
 0x2b6   : > { %v1161_v21 = vpop.f32.mrf.mxu1 }
 0x2b8   : > { %v1163_v59 = vpop.f32.mrf.mxu1 }
 0x2ba   : > { %v1165_v39 = vpop.f32.mrf.mxu1 }
 0x2bc   : > { %v1169_v62 = vpop.f32.mrf.mxu1 }
 0x2be   : > { %v2502_v22 = vpop.f32.mrf.mxu1 }
 0x2c0   : > { %v1173_v7 = vpop.f32.mrf.mxu1 }
 0x2c2   : > { %v2504_v23 = vpop.f32.mrf.mxu1 }
 0x2c4   : > { %v2506_v48 = vpop.f32.mrf.mxu1 }
 0x2c6   : > { %v2508_v6 = vpop.f32.mrf.mxu1 }
 0x2c8   : > { %v1183_v1 = vpop.f32.mrf.mxu1 }
 0x2ca   : > { %v2510_v56 = vpop.f32.mrf.mxu1 }
 0x2cc   : > { %v1189_v36 = vpop.f32.mrf.mxu1 }
 0x2cd   : > { %1816 = vrcp.f32 %v1189_v36 }
 0x2ce   : > { %v1191_v15 = vpop.f32.mrf.mxu1 }
 0x2cf   : > { %1818 = vrcp.f32 %v1191_v15 }
 0x2d0   : > { %v1193_v25 = vpop.f32.mrf.mxu1 }
 0x2d2   : > { %v1194_v30 = vpop.f32.mrf.mxu1 }
 0x2da   : > { %v1817_v0 = vpop.eup %1816 }
 0x2db   : > { %v2515_v31 = vrot.slane %v1817_v0, %v1200_v45 }
 0x2dc   : > { %v1819_v17 = vpop.eup %1818 }
 0x2dd   : > { %v1206_v43 = vmul.f32 %v2515_v31, %v1149_v38  ;;  %v1208_v44 = vmul.f32 %v2515_v31, %v1153_v8  ;;  %v1210_v35 = vmul.f32 %v2515_v31, %v1159_v10  ;;  %v1212_v40 = vmul.f32 %v2515_v31, %v1163_v59  ;;  %v1291_v8 = vld [vmem:[%s2531_s23 + $0x28] sm:$0xff]  ;;  %v1253_v10 = vpop.permute.xlu0 %1252 }
 0x2de   : > { %v2523_v13 = vrot.slane %v1819_v17, %v1200_v45  ;;  %v1216_v20 = vmul.f32 %v2515_v31, %v1173_v7  ;;  %v1214_v63 = vmul.f32 %v2515_v31, %v1169_v62  ;;  %v2528_v18 = vmul.f32 %v2515_v31, %v1183_v1  ;;  %v1268_v17 = vpop.permute.xlu1 %1267 }
 0x2df   : > { %v1270_v46 = vadd.f32 %v1233_v26, %v1206_v43  ;;  %v1272_v60 = vadd.f32 %v1238_v49, %v1208_v44  ;;  %v1274_v33 = vadd.f32 %v1243_v2, %v1210_v35  ;;  %v1276_v28 = vadd.f32 %v1248_v12, %v1212_v40 }
 0x2e0   : > { %v1207_v61 = vmul.f32 %v2523_v13, %v1151_v4  ;;  %v1209_v41 = vmul.f32 %v2523_v13, %v1155_v11  ;;  %v1211_v27 = vmul.f32 %v2523_v13, %v1161_v21  ;;  %v1213_v58 = vmul.f32 %v2523_v13, %v1165_v39  ;;  %v1289_v4 = vld [vmem:[%s2531_s23 + $0x18] sm:$0xff] }
 0x2e1   : > { %v1304_v19 = vmul.f32 %v2517_v32, %v1270_v46  ;;  %v1306_v42 = vmul.f32 %v2517_v32, %v1272_v60  ;;  %v1308_v24 = vmul.f32 %v2517_v32, %v1274_v33  ;;  %v1310_v34 = vmul.f32 %v2517_v32, %v1276_v28  ;;  %v1293_v11 = vld [vmem:[%s2531_s23 + $0x38] sm:$0xff]  ;;  %v1300_v33 = vld [vmem:[%s2531_s23 + $0x70] sm:$0xff] }
 0x2e2   : > { %v1271_v51 = vadd.f32 %v1233_v26, %v1207_v61  ;;  %v1273_v14 = vadd.f32 %v1238_v49, %v1209_v41  ;;  %v1275_v53 = vadd.f32 %v1243_v2, %v1211_v27  ;;  %v1277_v57 = vadd.f32 %v1248_v12, %v1213_v58  ;;  %v1296_v2 = vld [vmem:[%s2531_s23 + $0x50] sm:$0xff]  ;;  %v1294_v26 = vld [vmem:[%s2531_s23 + $0x40] sm:$0xff]  ;;  %v1295_v49 = vld [vmem:[%s2531_s23 + $0x48] sm:$0xff] }
 0x2e3   : > { %v1320_v54 = vadd.f32 %v1304_v19, %v1286_v47  ;;  %v1322_v9 = vadd.f32 %v1306_v42, %v1288_v50  ;;  %v1324_v16 = vadd.f32 %v1308_v24, %v1290_v52  ;;  %v1326_v38 = vadd.f32 %v1310_v34, %v1292_v29  ;;  %v1298_v50 = vld [vmem:[%s2531_s23 + $0x60] sm:$0xff]  ;;  %v1299_v52 = vld [vmem:[%s2531_s23 + $0x68] sm:$0xff] }
 0x2e4   : > { %v1305_v21 = vmul.f32 %v2517_v32, %v1271_v51  ;;  %v1307_v59 = vmul.f32 %v2517_v32, %v1273_v14  ;;  %v1309_v39 = vmul.f32 %v2517_v32, %v1275_v53  ;;  %v1311_v62 = vmul.f32 %v2517_v32, %v1277_v57 }
 0x2e5   : > { %1336 = vst [vmem:[%s2554_s25] sm:$0xff] %v1320_v54  ;;  %1338 = vst [vmem:[%s2554_s25 + $0x10] sm:$0xff] %v1322_v9  ;;  %v1217_v7 = vmul.f32 %v2523_v13, %v2504_v23  ;;  %v1280_v1 = vadd.f32 %v1258_v55, %v1216_v20  ;;  %v1215_v36 = vmul.f32 %v2523_v13, %v2502_v22  ;;  %v1297_v22 = vld [vmem:[%s2531_s23 + $0x58] sm:$0xff] }
 0x2e6   : > { %1340 = vst [vmem:[%s2554_s25 + $0x20] sm:$0xff] %v1324_v16  ;;  %1342 = vst [vmem:[%s2554_s25 + $0x30] sm:$0xff] %v1326_v38  ;;  %v1278_v15 = vadd.f32 %v1253_v10, %v1214_v63  ;;  %v1321_v37 = vadd.f32 %v1305_v21, %v1287_v5  ;;  %v1323_v25 = vadd.f32 %v1307_v59, %v1289_v4 }
 0x2e7   : > { %v1325_v30 = vadd.f32 %v1309_v39, %v1291_v8  ;;  %v1327_v3 = vadd.f32 %v1311_v62, %v1293_v11  ;;  %v1281_v45 = vadd.f32 %v1258_v55, %v1217_v7  ;;  %v1314_v0 = vmul.f32 %v2517_v32, %v1280_v1 }
 0x2e8   : > { %v1279_v23 = vadd.f32 %v1253_v10, %v1215_v36  ;;  %v1312_v12 = vmul.f32 %v2517_v32, %v1278_v15  ;;  %1337 = vst [vmem:[%s2554_s25 + $0x8] sm:$0xff] %v1321_v37  ;;  %1339 = vst [vmem:[%s2554_s25 + $0x18] sm:$0xff] %v1323_v25  ;;  %v1221_v43 = vmul.f32 %v2523_v13, %v2510_v56  ;;  %v1263_v56 = vpop.permute.xlu0 %1262 }
 0x2e9   : > { %1341 = vst [vmem:[%s2554_s25 + $0x28] sm:$0xff] %v1325_v30  ;;  %1343 = vst [vmem:[%s2554_s25 + $0x38] sm:$0xff] %v1327_v3  ;;  %v1284_v44 = vadd.f32 %v1268_v17, %v2528_v18  ;;  %v1218_v35 = vmul.f32 %v2515_v31, %v2506_v48  ;;  %v1219_v40 = vmul.f32 %v2523_v13, %v2508_v6  ;;  %v1301_v13 = vld [vmem:[%s2531_s23 + $0x78] sm:$0xff] }
 0x2ea   : > { %v1315_v20 = vmul.f32 %v2517_v32, %v1281_v45  ;;  %v1330_v63 = vadd.f32 %v1314_v0, %v1296_v2  ;;  %v1313_v46 = vmul.f32 %v2517_v32, %v1279_v23  ;;  %v1328_v60 = vadd.f32 %v1312_v12, %v1294_v26 }
 0x2eb   : > { %v1285_v18 = vadd.f32 %v1268_v17, %v1221_v43  ;;  %v1318_v28 = vmul.f32 %v2517_v32, %v1284_v44  ;;  %v1282_v48 = vadd.f32 %v1263_v56, %v1218_v35  ;;  %v1283_v31 = vadd.f32 %v1263_v56, %v1219_v40 }
 0x2ec   : > { %v1331_v47 = vadd.f32 %v1315_v20, %v1297_v22  ;;  %1346 = vst [vmem:[%s2554_s25 + $0x50] sm:$0xff] %v1330_v63  ;;  %v1329_v6 = vadd.f32 %v1313_v46, %v1295_v49  ;;  %1344 = vst [vmem:[%s2554_s25 + $0x40] sm:$0xff] %v1328_v60  ;;  %v1380_v34 = vld [vmem:[%s2554_s25 + $0x10] sm:$0xff] (%p1963_p6) }
 0x2ed   : > { %v1319_v29 = vmul.f32 %v2517_v32, %v1285_v18  ;;  %v1334_v61 = vadd.f32 %v1318_v28, %v1300_v33  ;;  %v1316_v41 = vmul.f32 %v2517_v32, %v1282_v48  ;;  %v1317_v27 = vmul.f32 %v2517_v32, %v1283_v31  ;;  %v1376_v32 = vld [vmem:[%s2554_s25] sm:$0xff] (%p1963_p6)  ;;  %v1388_v53 = vld [vmem:[%s2554_s25 + $0x30] sm:$0xff] (%p1963_p6)  ;;  %1381 = vst [vmem:[%s1363_s22 + $0x40] sm:$0xff] (%p1963_p6), %v1380_v34 }
 0x2ee   : > { %1347 = vst [vmem:[%s2554_s25 + $0x58] sm:$0xff] %v1331_v47  ;;  %1345 = vst [vmem:[%s2554_s25 + $0x48] sm:$0xff] %v1329_v6  ;;  %1358 = sbr.rel (!%p1963_p6) target bundleno = 763 (0x2fb), region = 71  ;;  %v1384_v51 = vld [vmem:[%s2554_s25 + $0x20] sm:$0xff] (%p1963_p6) }
 0x2ef   : > { %v1335_v58 = vadd.f32 %v1319_v29, %v1301_v13  ;;  %1350 = vst [vmem:[%s2554_s25 + $0x70] sm:$0xff] %v1334_v61  ;;  %v1332_v19 = vadd.f32 %v1316_v41, %v1298_v50  ;;  %v1333_v42 = vadd.f32 %v1317_v27, %v1299_v52  ;;  %v1378_v24 = vld [vmem:[%s2554_s25 + $0x8] sm:$0xff] (%p1963_p6)  ;;  %v1382_v55 = vld [vmem:[%s2554_s25 + $0x18] sm:$0xff] (%p1963_p6)  ;;  %1377 = vst [vmem:[%s1363_s22] sm:$0xff] (%p1963_p6), %v1376_v32 }
 0x2f0   : > { %v1386_v14 = vld [vmem:[%s2554_s25 + $0x28] sm:$0xff] (%p1963_p6)  ;;  %v1390_v57 = vld [vmem:[%s2554_s25 + $0x38] sm:$0xff] (%p1963_p6)  ;;  %1379 = vst [vmem:[%s1363_s22 + $0x8] sm:$0xff] (%p1963_p6), %v1378_v24  ;;  %1383 = vst [vmem:[%s1363_s22 + $0x48] sm:$0xff] (%p1963_p6), %v1382_v55 }
 0x2f1   : > { %1351 = vst [vmem:[%s2554_s25 + $0x78] sm:$0xff] %v1335_v58  ;;  %1348 = vst [vmem:[%s2554_s25 + $0x60] sm:$0xff] %v1332_v19 }
 0x2f2   : > { %1349 = vst [vmem:[%s2554_s25 + $0x68] sm:$0xff] %v1333_v42  ;;  %1385 = vst [vmem:[%s1363_s22 + $0x80] sm:$0xff] (%p1963_p6), %v1384_v51 }
 0x2f3   : > { %v1392_v5 = vld [vmem:[%s2554_s25 + $0x40] sm:$0xff]  ;;  %v1396_v9 = vld [vmem:[%s2554_s25 + $0x50] sm:$0xff]  ;;  %1387 = vst [vmem:[%s1363_s22 + $0x88] sm:$0xff] %v1386_v14  ;;  %1389 = vst [vmem:[%s1363_s22 + $0xc0] sm:$0xff] %v1388_v53 }
 0x2f4   : > { %1391 = vst [vmem:[%s1363_s22 + $0xc8] sm:$0xff] %v1390_v57  ;;  %1393 = vst [vmem:[%s1363_s22 + $0x100] sm:$0xff] %v1392_v5 }
 0x2f5   : > { %v1394_v54 = vld [vmem:[%s2554_s25 + $0x48] sm:$0xff]  ;;  %v1398_v16 = vld [vmem:[%s2554_s25 + $0x58] sm:$0xff]  ;;  %1397 = vst [vmem:[%s1363_s22 + $0x140] sm:$0xff] %v1396_v9 }
 0x2f6   : > { %1395 = vst [vmem:[%s1363_s22 + $0x108] sm:$0xff] %v1394_v54  ;;  %1399 = vst [vmem:[%s1363_s22 + $0x148] sm:$0xff] %v1398_v16  ;;  %v1404_v8 = vld [vmem:[%s2554_s25 + $0x70] sm:$0xff] }
 0x2f7   : > { %1405 = vst [vmem:[%s1363_s22 + $0x1c0] sm:$0xff] %v1404_v8 }
 0x2f8   : > { %v1400_v38 = vld [vmem:[%s2554_s25 + $0x60] sm:$0xff]  ;;  %v1406_v11 = vld [vmem:[%s2554_s25 + $0x78] sm:$0xff] }
 0x2f9   : > { %v1402_v4 = vld [vmem:[%s2554_s25 + $0x68] sm:$0xff]  ;;  %1401 = vst [vmem:[%s1363_s22 + $0x180] sm:$0xff] %v1400_v38  ;;  %1407 = vst [vmem:[%s1363_s22 + $0x1c8] sm:$0xff] %v1406_v11 }
 0x2fa   : > { %1403 = vst [vmem:[%s1363_s22 + $0x188] sm:$0xff] %v1402_v4 }
 0x2fb PF: > { %s17_s29 = sadd.s32 1, %s1874_s29   ;;  %s2708_s23 = smov %s1854_s24 }
 0x2fc   : > { %p14_p0 = scmp.ge.s32.totalorder %s17_s29, 10   ;;  %s2709_s24 = smov %s1971_s13 }
 0x2fd   : > { %s2710_s25 = smov %s1866_s27  ;;  %s2711_s26 = smov %s1870_s28 }
 0x2fe   : > { %s2712_s27 = smov %s2715_s5  ;;  %s2713_s28 = smov %s2719_s30 }
 0x2ff   :  { %16 = sbr.rel (!%p14_p0) target bundleno = 6 (0x6), region = 134 }

// kernel: self_attn_pallas.2
= control target key start
LH: loop header
LB: loop body
LE: loop exit
PB: predicated region body
PF: predicated region fallthrough
CT: control target
= control target key end

     0   :  { %s1714_s21 = smov 0   ;;  %s2145_s0 = inlined_call_operand.vmem [shape: f32[2,64,1024], index: 0, kind: input, shape index: {}]   ;;  %s2146_s1 = inlined_call_operand.vmem [shape: f32[48,64], index: 1, kind: input, shape index: {}]   ;;  %s2147_s2 = inlined_call_operand.vmem [shape: f32[48,1], index: 2, kind: input, shape index: {}]   ;;  %s2148_s3 = inlined_call_operand.vmem [shape: f32[64,32], index: 3, kind: input, shape index: {}]   ;;  %s2149_s4 = inlined_call_operand.vmem [shape: bf16[2,8,1024], index: 4, kind: output, shape index: {0}]   ;;  %s2150_s5 = inlined_call_operand.vmem [shape: bf16[2,256,8], index: 5, kind: output, shape index: {1}]   ;;  %s2151_s6 = inlined_call_operand.vmem [shape: bf16[2,64,256], index: 6, kind: output, shape index: {2}]  }
   0x1 LB: > { %s1420_s22 = sadd.s32 4294967295, %s1675_s21   ;;  %p1424_p0 = scmp.ge.s32.totalorder %s1675_s21, 1  ;;  %s1675_s21 = sphi %s1714_s21, %s17_s21  }
   0x2   : > { %p217_p1 = scmp.lt.s32.totalorder %s1675_s21, 3 }
   0x4   : > { %p218_p2 = pnand %p1424_p0, %p217_p1 }
   0x5   : > { %p257_p3 = scmp.lt.s32.totalorder (!%p218_p2), %s1420_s22, 1 }
   0x6   : > { %221 = sbr.rel (%p218_p2) target bundleno = 526 (0x20e), region = 36 }
   0xb   : > { %v1677_v0 = vmov 0.0   ;;  %s2153_s22 = smov (!%p257_p3, %s1420_s22), 1  ;;  %v1678_v1 = vmov 0   ;;  %v350_v2 = vld [vmem:[%s2147_s2 + $0x18] sm:$0xff]  ;;  %v352_v3 = vld [vmem:[%s2147_s2 + $0x28] sm:$0xff]  ;;  %v1773_v36 = vld [vmem:[%s2146_s1] sm:$0xff] }
   0xc   : > { %466 = vmatprep.mubr.f32.mxu0 %v1677_v0  ;;  %567 = vmatprep.mubr.f32.mxu1 %v1677_v0  ;;  %s1511_s27 = sshll.u32 %s2153_s22, 9  ;;  %vm383_vm0 = vcmask 523264   ;;  %v1786_v40 = vld [vmem:[%s2146_s1 + $0x8] sm:$0xff]  ;;  %v1800_v44 = vld [vmem:[%s2146_s1 + $0x10] sm:$0xff]  ;;  %v1814_v48 = vld [vmem:[%s2146_s1 + $0x18] sm:$0xff]  ;;  %s1512_s29 = sshll.u32 %s2153_s22, 5 }
   0xd   : > { %1586 = vset.pattern.permute.xlu1 %v1678_v1  ;;  %1585 = vset.pattern.permute.xlu0 %v1678_v1  ;;  %s1736_s30 = scalar_lea.vmem %s2145_s0, %s1511_s27  ;;  %v1828_v52 = vld [vmem:[%s2146_s1 + $0x20] sm:$0xff]  ;;  %v1842_v56 = vld [vmem:[%s2146_s1 + $0x28] sm:$0xff]  ;;  %s1923_s8 = scalar_lea.vmem %s2149_s4, %s1512_s29  ;;  %vm1105_vm1 = vcmask 261120   ;;  %vm1064_vm2 = vcmask 60416  }
   0xe   : > { %370 = vperm.xlu1 %1586, %v350_v2   ;;  %380 = vperm.xlu0 %1585, %v352_v3   ;;  %v334_v4 = vld [vmem:[%s1736_s30 + $0x1c8] sm:$0xff]  ;;  %v336_v5 = vld [vmem:[%s1736_s30 + $0x1d8] sm:$0xff]  ;;  %v333_v6 = vld [vmem:[%s1736_s30 + $0x1c0] sm:$0xff]  ;;  %s1513_s27 = sshll.u32 %s2153_s22, 7  ;;  %s1514_s7 = sshll.u32 %s2153_s22, 6 }
   0xf   : > { %418 = vmatprep.subr.mxu0 %v334_v4  ;;  %519 = vmatprep.subr.mxu1 %v336_v5  ;;  %v335_v7 = vld [vmem:[%s1736_s30 + $0x1d0] sm:$0xff]  ;;  %v326_v8 = vld [vmem:[%s1736_s30 + $0x188] sm:$0xff]  ;;  %v328_v9 = vld [vmem:[%s1736_s30 + $0x198] sm:$0xff]  ;;  %s2132_s10 = scalar_lea.vmem %s2151_s6, %s1514_s7 }
  0x10   : > { %419 = vmatpush1.msra.mxu0 %v333_v6  ;;  %520 = vmatpush1.msra.mxu1 %v335_v7  ;;  %v325_v10 = vld [vmem:[%s1736_s30 + $0x180] sm:$0xff]  ;;  %v327_v11 = vld [vmem:[%s1736_s30 + $0x190] sm:$0xff]  ;;  %v318_v12 = vld [vmem:[%s1736_s30 + $0x148] sm:$0xff] }
  0x11   : > { %420 = vmatprep.subr.mxu0 %v326_v8  ;;  %521 = vmatprep.subr.mxu1 %v328_v9  ;;  %v320_v13 = vld [vmem:[%s1736_s30 + $0x158] sm:$0xff]  ;;  %v317_v14 = vld [vmem:[%s1736_s30 + $0x140] sm:$0xff]  ;;  %v319_v15 = vld [vmem:[%s1736_s30 + $0x150] sm:$0xff] }
  0x12   : > { %421 = vmatpush1.msra.mxu0 %v325_v10  ;;  %522 = vmatpush1.msra.mxu1 %v327_v11  ;;  %v310_v16 = vld [vmem:[%s1736_s30 + $0x108] sm:$0xff]  ;;  %v312_v17 = vld [vmem:[%s1736_s30 + $0x118] sm:$0xff]  ;;  %v309_v18 = vld [vmem:[%s1736_s30 + $0x100] sm:$0xff] }
  0x13   : > { %422 = vmatprep.subr.mxu0 %v318_v12  ;;  %523 = vmatprep.subr.mxu1 %v320_v13  ;;  %v311_v19 = vld [vmem:[%s1736_s30 + $0x110] sm:$0xff]  ;;  %v302_v20 = vld [vmem:[%s1736_s30 + $0xc8] sm:$0xff]  ;;  %v304_v21 = vld [vmem:[%s1736_s30 + $0xd8] sm:$0xff] }
  0x14   : > { %423 = vmatpush1.msra.mxu0 %v317_v14  ;;  %524 = vmatpush1.msra.mxu1 %v319_v15  ;;  %v301_v22 = vld [vmem:[%s1736_s30 + $0xc0] sm:$0xff]  ;;  %v303_v23 = vld [vmem:[%s1736_s30 + $0xd0] sm:$0xff]  ;;  %v294_v24 = vld [vmem:[%s1736_s30 + $0x88] sm:$0xff] }
  0x15   : > { %424 = vmatprep.subr.mxu0 %v310_v16  ;;  %525 = vmatprep.subr.mxu1 %v312_v17  ;;  %v296_v25 = vld [vmem:[%s1736_s30 + $0x98] sm:$0xff]  ;;  %v293_v26 = vld [vmem:[%s1736_s30 + $0x80] sm:$0xff]  ;;  %v295_v27 = vld [vmem:[%s1736_s30 + $0x90] sm:$0xff] }
  0x16   : > { %425 = vmatpush1.msra.mxu0 %v309_v18  ;;  %526 = vmatpush1.msra.mxu1 %v311_v19  ;;  %v286_v28 = vld [vmem:[%s1736_s30 + $0x48] sm:$0xff]  ;;  %v288_v29 = vld [vmem:[%s1736_s30 + $0x58] sm:$0xff]  ;;  %v285_v30 = vld [vmem:[%s1736_s30 + $0x40] sm:$0xff] }
  0x17   : > { %426 = vmatprep.subr.mxu0 %v302_v20  ;;  %527 = vmatprep.subr.mxu1 %v304_v21  ;;  %v287_v31 = vld [vmem:[%s1736_s30 + $0x50] sm:$0xff]  ;;  %v278_v32 = vld [vmem:[%s1736_s30 + $0x8] sm:$0xff]  ;;  %v280_v33 = vld [vmem:[%s1736_s30 + $0x18] sm:$0xff] }
  0x18   : > { %427 = vmatpush1.msra.mxu0 %v301_v22  ;;  %528 = vmatpush1.msra.mxu1 %v303_v23  ;;  %v277_v34 = vld [vmem:[%s1736_s30] sm:$0xff]  ;;  %v279_v35 = vld [vmem:[%s1736_s30 + $0x10] sm:$0xff]  ;;  %v338_v37 = vld [vmem:[%s1736_s30 + $0x1e8] sm:$0xff] }
  0x19   : > { %428 = vmatprep.subr.mxu0 %v294_v24  ;;  %529 = vmatprep.subr.mxu1 %v296_v25  ;;  %v337_v38 = vld [vmem:[%s1736_s30 + $0x1e0] sm:$0xff]  ;;  %v330_v39 = vld [vmem:[%s1736_s30 + $0x1a8] sm:$0xff]  ;;  %v340_v58 = vld [vmem:[%s1736_s30 + $0x1f8] sm:$0xff] }
  0x1a   : > { %429 = vmatpush1.msra.mxu0 %v293_v26  ;;  %530 = vmatpush1.msra.mxu1 %v295_v27  ;;  %v329_v41 = vld [vmem:[%s1736_s30 + $0x1a0] sm:$0xff]  ;;  %v322_v42 = vld [vmem:[%s1736_s30 + $0x168] sm:$0xff]  ;;  %v339_v59 = vld [vmem:[%s1736_s30 + $0x1f0] sm:$0xff] }
  0x1b   : > { %430 = vmatprep.subr.mxu0 %v286_v28  ;;  %531 = vmatprep.subr.mxu1 %v288_v29  ;;  %v321_v43 = vld [vmem:[%s1736_s30 + $0x160] sm:$0xff]  ;;  %v314_v45 = vld [vmem:[%s1736_s30 + $0x128] sm:$0xff]  ;;  %v332_v60 = vld [vmem:[%s1736_s30 + $0x1b8] sm:$0xff] }
  0x1c   : > { %431 = vmatpush1.msra.mxu0 %v285_v30  ;;  %532 = vmatpush1.msra.mxu1 %v287_v31  ;;  %v313_v46 = vld [vmem:[%s1736_s30 + $0x120] sm:$0xff]  ;;  %v306_v47 = vld [vmem:[%s1736_s30 + $0xe8] sm:$0xff]  ;;  %v331_v61 = vld [vmem:[%s1736_s30 + $0x1b0] sm:$0xff] }
  0x1d   : > { %432 = vmatprep.subr.mxu0 %v278_v32  ;;  %533 = vmatprep.subr.mxu1 %v280_v33  ;;  %v305_v49 = vld [vmem:[%s1736_s30 + $0xe0] sm:$0xff]  ;;  %v298_v50 = vld [vmem:[%s1736_s30 + $0xa8] sm:$0xff]  ;;  %v324_v62 = vld [vmem:[%s1736_s30 + $0x178] sm:$0xff] }
  0x1e   : > { %433 = vmatpush1.msra.mxu0 %v277_v34  ;;  %534 = vmatpush1.msra.mxu1 %v279_v35  ;;  %v297_v51 = vld [vmem:[%s1736_s30 + $0xa0] sm:$0xff]  ;;  %v290_v53 = vld [vmem:[%s1736_s30 + $0x68] sm:$0xff]  ;;  %v323_v63 = vld [vmem:[%s1736_s30 + $0x170] sm:$0xff] }
  0x1f   : > { %1433 = vmatmul.mubr.msk.f32.vlgmr.msra.gmra.mxu0 %vm383_vm0, %v1773_v36  ;;  %1439 = vmatmul.mubr.msk.f32.vlgmr.msra.gmra.mxu1 %vm383_vm0, %v1773_v36  ;;  %v289_v54 = vld [vmem:[%s1736_s30 + $0x60] sm:$0xff]  ;;  %v282_v55 = vld [vmem:[%s1736_s30 + $0x28] sm:$0xff]  ;;  %v316_v1 = vld [vmem:[%s1736_s30 + $0x138] sm:$0xff] }
  0x20   : > { %1559 = vmatprep.subr.mxu1 %v338_v37  ;;  %472 = vmatprep.mubr.f32.mxu0 %v1677_v0  ;;  %v281_v57 = vld [vmem:[%s1736_s30 + $0x20] sm:$0xff]  ;;  %v315_v2 = vld [vmem:[%s1736_s30 + $0x130] sm:$0xff]  ;;  %v308_v3 = vld [vmem:[%s1736_s30 + $0xf8] sm:$0xff] }
  0x21   : > { %1567 = vmatpush1.msra.mxu1 %v337_v38  ;;  %573 = vmatprep.mubr.f32.mxu1 %v1677_v0  ;;  %v307_v4 = vld [vmem:[%s1736_s30 + $0xf0] sm:$0xff]  ;;  %v300_v5 = vld [vmem:[%s1736_s30 + $0xb8] sm:$0xff]  ;;  %v351_v12 = vld [vmem:[%s2147_s2 + $0x20] sm:$0xff] }
  0x22   : > { %1560 = vmatprep.subr.mxu1 %v330_v39  ;;  %620 = vmatprep.subr.mxu0 %v338_v37  ;;  %v299_v6 = vld [vmem:[%s1736_s30 + $0xb0] sm:$0xff]  ;;  %v292_v7 = vld [vmem:[%s1736_s30 + $0x78] sm:$0xff]  ;;  %v347_v13 = vld [vmem:[%s2147_s2] sm:$0xff] }
  0x23   : > { %1434 = vmatmul.mubr.msk.f32.gmra.mxu0 %vm383_vm0, %v1786_v40  ;;  %1440 = vmatmul.mubr.msk.f32.gmra.mxu1 %vm383_vm0, %v1786_v40  ;;  %v291_v8 = vld [vmem:[%s1736_s30 + $0x70] sm:$0xff]  ;;  %v284_v9 = vld [vmem:[%s1736_s30 + $0x38] sm:$0xff]  ;;  %v348_v14 = vld [vmem:[%s2147_s2 + $0x8] sm:$0xff] }
  0x24   : > { %1568 = vmatpush1.msra.mxu1 %v329_v41  ;;  %478 = vmatprep.mubr.f32.mxu0 %v1677_v0  ;;  %v283_v10 = vld [vmem:[%s1736_s30 + $0x30] sm:$0xff]  ;;  %s2062_s30 = scalar_lea.vmem %s2150_s5, %s1513_s27 }
  0x25   : > { %1561 = vmatprep.subr.mxu1 %v322_v42  ;;  %579 = vmatprep.mubr.f32.mxu1 %v1677_v0  ;;  %v349_v11 = vld [vmem:[%s2147_s2 + $0x10] sm:$0xff] }
  0x26   : > { %1569 = vmatpush1.msra.mxu1 %v321_v43  ;;  %621 = vmatpush1.msra.mxu0 %v337_v38 }
  0x27   : > { %1435 = vmatmul.mubr.msk.f32.gmra.mxu0 %vm383_vm0, %v1800_v44  ;;  %1441 = vmatmul.mubr.msk.f32.gmra.mxu1 %vm383_vm0, %v1800_v44 }
  0x28   : > { %1562 = vmatprep.subr.mxu1 %v314_v45  ;;  %484 = vmatprep.mubr.f32.mxu0 %v1677_v0 }
  0x29   : > { %1570 = vmatpush1.msra.mxu1 %v313_v46  ;;  %585 = vmatprep.mubr.f32.mxu1 %v1677_v0 }
  0x2a   : > { %1563 = vmatprep.subr.mxu1 %v306_v47  ;;  %622 = vmatprep.subr.mxu0 %v330_v39 }
  0x2b   : > { %1436 = vmatmul.mubr.msk.f32.gmra.mxu0 %vm383_vm0, %v1814_v48  ;;  %1442 = vmatmul.mubr.msk.f32.gmra.mxu1 %vm383_vm0, %v1814_v48 }
  0x2c   : > { %1571 = vmatpush1.msra.mxu1 %v305_v49  ;;  %490 = vmatprep.mubr.f32.mxu0 %v1677_v0 }
  0x2d   : > { %591 = vmatprep.mubr.f32.mxu1 %v1677_v0  ;;  %1564 = vmatprep.subr.mxu1 %v298_v50 }
  0x2e   : > { %1572 = vmatpush1.msra.mxu1 %v297_v51  ;;  %623 = vmatpush1.msra.mxu0 %v329_v41 }
  0x2f   : > { %1437 = vmatmul.mubr.msk.f32.gmra.mxu0 %vm383_vm0, %v1828_v52  ;;  %1443 = vmatmul.mubr.msk.f32.gmra.mxu1 %vm383_vm0, %v1828_v52 }
  0x30   : > { %1565 = vmatprep.subr.mxu1 %v290_v53  ;;  %496 = vmatprep.mubr.f32.mxu0 %v1677_v0 }
  0x31   : > { %597 = vmatprep.mubr.f32.mxu1 %v1677_v0  ;;  %1573 = vmatpush1.msra.mxu1 %v289_v54 }
  0x32   : > { %1566 = vmatprep.subr.mxu1 %v282_v55  ;;  %624 = vmatprep.subr.mxu0 %v322_v42 }
  0x33   : > { %1438 = vmatmul.mubr.msk.f32.gmra.mxu0 %vm383_vm0, %v1842_v56  ;;  %1444 = vmatmul.mubr.msk.f32.gmra.mxu1 %vm383_vm0, %v1842_v56 }
  0x34   : > { %1574 = vmatpush1.msra.mxu1 %v281_v57  ;;  %680 = vmatprep.mubr.f32.mxu1 %v1677_v0 }
  0x35   : > { %721 = vmatprep.subr.mxu1 %v340_v58  ;;  %625 = vmatpush1.msra.mxu0 %v321_v43 }
  0x36   : > { %626 = vmatprep.subr.mxu0 %v314_v45  ;;  %668 = vmatprep.mubr.f32.mxu0 %v1677_v0 }
  0x37   : > { %1447 = vmatmul.mubr.msk.f32.vlgmr.msra.gmra.mxu1 %vm383_vm0, %v1800_v44  ;;  %627 = vmatpush1.msra.mxu0 %v313_v46 }
  0x38   : > { %722 = vmatpush1.msra.mxu1 %v339_v59  ;;  %686 = vmatprep.mubr.f32.mxu1 %v1677_v0 }
  0x39   : > { %723 = vmatprep.subr.mxu1 %v332_v60  ;;  %628 = vmatprep.subr.mxu0 %v306_v47 }
  0x3a   : > { %724 = vmatpush1.msra.mxu1 %v331_v61  ;;  %629 = vmatpush1.msra.mxu0 %v305_v49 }
  0x3b   : > { %1448 = vmatmul.mubr.msk.f32.gmra.mxu1 %vm383_vm0, %v1814_v48  ;;  %725 = vmatprep.subr.mxu1 %v324_v62 }
  0x3c   : > { %726 = vmatpush1.msra.mxu1 %v323_v63  ;;  %692 = vmatprep.mubr.f32.mxu1 %v1677_v0 }
  0x3d   : > { %727 = vmatprep.subr.mxu1 %v316_v1  ;;  %630 = vmatprep.subr.mxu0 %v298_v50 }
  0x3e   : > { %728 = vmatpush1.msra.mxu1 %v315_v2  ;;  %631 = vmatpush1.msra.mxu0 %v297_v51 }
  0x3f   : > { %1449 = vmatmul.mubr.msk.f32.gmra.mxu1 %vm383_vm0, %v1828_v52  ;;  %729 = vmatprep.subr.mxu1 %v308_v3 }
  0x40   : > { %730 = vmatpush1.msra.mxu1 %v307_v4  ;;  %698 = vmatprep.mubr.f32.mxu1 %v1677_v0 }
  0x41   : > { %731 = vmatprep.subr.mxu1 %v300_v5  ;;  %632 = vmatprep.subr.mxu0 %v290_v53 }
  0x42   : > { %732 = vmatpush1.msra.mxu1 %v299_v6  ;;  %633 = vmatpush1.msra.mxu0 %v289_v54 }
  0x43   : > { %1450 = vmatmul.mubr.msk.f32.gmra.mxu1 %vm383_vm0, %v1842_v56  ;;  %733 = vmatprep.subr.mxu1 %v292_v7 }
  0x44   : > { %734 = vmatpush1.msra.mxu1 %v291_v8  ;;  %634 = vmatprep.subr.mxu0 %v282_v55 }
  0x45   : > { %735 = vmatprep.subr.mxu1 %v284_v9  ;;  %635 = vmatpush1.msra.mxu0 %v281_v57 }
  0x46   : > { %736 = vmatpush1.msra.mxu1 %v283_v10  ;;  %769 = vmatprep.mubr.f32.mxu1 %v1677_v0 }
  0x47   : > { %1445 = vmatmul.mubr.msk.f32.vlgmr.msra.gmra.mxu0 %vm383_vm0, %v1773_v36  ;;  %1451 = vmatmul.mubr.msk.f32.vlgmr.msra.gmra.mxu1 %vm383_vm0, %v1773_v36 }
  0x48   : > { %674 = vmatprep.mubr.f32.mxu0 %v1677_v0  ;;  %775 = vmatprep.mubr.f32.mxu1 %v1677_v0 }
  0x49   : > { %365 = vperm.xlu1 %1586, %v349_v11   ;;  %375 = vperm.xlu0 %1585, %v351_v12  }
  0x4b   : > { %1446 = vmatmul.mubr.msk.f32.gmra.mxu0 %vm383_vm0, %v1786_v40  ;;  %1452 = vmatmul.mubr.msk.f32.gmra.mxu1 %vm383_vm0, %v1786_v40 }
  0x4c   : > { %781 = vmatprep.mubr.f32.mxu1 %v1677_v0  ;;  %1194 = vmatprep.mubr.f32.mxu0 %v1677_v0 }
  0x4d   : > { %355 = vperm.xlu1 %1586, %v347_v13   ;;  %360 = vperm.xlu0 %1585, %v348_v14  }
  0x4f   : > { %1453 = vmatmul.mubr.msk.f32.gmra.mxu1 %vm383_vm0, %v1800_v44 }
  0x50   : > { %787 = vmatprep.mubr.f32.mxu1 %v1677_v0 }
  0x53   : > { %1454 = vmatmul.mubr.msk.f32.gmra.mxu1 %vm383_vm0, %v1814_v48 }
  0x54   : > { %793 = vmatprep.mubr.f32.mxu1 %v1677_v0 }
  0x57   : > { %1455 = vmatmul.mubr.msk.f32.gmra.mxu1 %vm383_vm0, %v1828_v52 }
  0x58   : > { %799 = vmatprep.mubr.f32.mxu1 %v1677_v0 }
  0x5b   : > { %1456 = vmatmul.mubr.msk.f32.gmra.mxu1 %vm383_vm0, %v1842_v56 }
  0x89   : > { %v1915_v15 = vpop.permute.xlu1 %370  ;;  %v1951_v48 = vpop.permute.xlu0 %380 }
  0xc4   : > { %v1917_v16 = vpop.permute.xlu1 %365  ;;  %v1959_v54 = vpop.permute.xlu0 %375 }
  0xc8   : > { %v356_v17 = vpop.permute.xlu1 %355  ;;  %v361_v60 = vpop.permute.xlu0 %360 }
  0xdf   : > { %v468_v18 = vpop.f32.mrf.mxu0  ;;  %v569_v19 = vpop.f32.mrf.mxu1 }
  0xe0   : > { %v469_v20 = vadd.f32 %v468_v18, %v356_v17  ;;  %v570_v23 = vadd.f32 %v569_v19, %v356_v17 }
  0xe1   : > { %v470_v21 = vpop.f32.mrf.mxu0  ;;  %v571_v22 = vpop.f32.mrf.mxu1 }
  0xe2   : > { %v471_v24 = vadd.f32 %v470_v21, %v356_v17  ;;  %v572_v25 = vadd.f32 %v571_v22, %v356_v17 }
  0xe3   : > { %v474_v26 = vpop.f32.mrf.mxu0  ;;  %v575_v27 = vpop.f32.mrf.mxu1 }
  0xe4   : > { %v1515_v28 = vpack.c.bf16 %v471_v24, %v469_v20  ;;  %v1516_v29 = vpack.c.bf16 %v572_v25, %v570_v23  ;;  %v475_v4 = vadd.f32 %v474_v26, %v361_v60  ;;  %v576_v5 = vadd.f32 %v575_v27, %v361_v60 }
  0xe5   : > { %v476_v30 = vpop.f32.mrf.mxu0  ;;  %v577_v31 = vpop.f32.mrf.mxu1 }
  0xe6   : > { %838 = vst [vmem:[%s1923_s8] sm:$0xff] %v1515_v28  ;;  %839 = vst [vmem:[%s1923_s8 + $0x8] sm:$0xff] %v1516_v29  ;;  %v477_v6 = vadd.f32 %v476_v30, %v361_v60  ;;  %v578_v7 = vadd.f32 %v577_v31, %v361_v60  ;;  %v842_v23 = vmax.f32 %v475_v4, %v576_v5 }
  0xe7   : > { %v1927_v32 = vpop.f32.mrf.mxu1  ;;  %v1929_v33 = vpop.f32.mrf.mxu0 }
  0xe9   : > { %v1931_v34 = vpop.f32.mrf.mxu1  ;;  %v482_v36 = vpop.f32.mrf.mxu0 }
  0xeb   : > { %v1933_v35 = vpop.f32.mrf.mxu1  ;;  %v486_v39 = vpop.f32.mrf.mxu0 }
  0xed   : > { %v1935_v37 = vpop.f32.mrf.mxu1  ;;  %v488_v42 = vpop.f32.mrf.mxu0 }
  0xef   : > { %v1937_v38 = vpop.f32.mrf.mxu1  ;;  %v492_v45 = vpop.f32.mrf.mxu0 }
  0xf1   : > { %v1939_v40 = vpop.f32.mrf.mxu1  ;;  %v494_v49 = vpop.f32.mrf.mxu0 }
  0xf3   : > { %v1941_v41 = vpop.f32.mrf.mxu1  ;;  %v498_v52 = vpop.f32.mrf.mxu0 }
  0xf5   : > { %v1943_v43 = vpop.f32.mrf.mxu1  ;;  %v500_v56 = vpop.f32.mrf.mxu0 }
  0xf7   : > { %v1945_v44 = vpop.f32.mrf.mxu1 }
  0xf9   : > { %v1947_v46 = vpop.f32.mrf.mxu1 }
  0xfb   : > { %v1949_v47 = vpop.f32.mrf.mxu1 }
  0xfd   : > { %v1953_v50 = vpop.f32.mrf.mxu1 }
  0xff   : > { %v1955_v51 = vpop.f32.mrf.mxu1 }
 0x101   : > { %v1957_v53 = vpop.f32.mrf.mxu1 }
 0x103   : > { %v700_v55 = vpop.f32.mrf.mxu1 }
 0x105   : > { %v1961_v57 = vpop.f32.mrf.mxu1 }
 0x107   : > { %v670_v58 = vpop.f32.mrf.mxu0  ;;  %v771_v59 = vpop.f32.mrf.mxu1 }
 0x108   : > { %v671_v61 = vadd.f32 %v670_v58, %v356_v17  ;;  %v772_v1 = vadd.f32 %v771_v59, %v356_v17  ;;  %v1967_v58 = vadd.f32 %v1929_v33, %v1917_v16  ;;  %v1971_v59 = vadd.f32 %v1927_v32, %v1917_v16 }
 0x109   : > { %v672_v62 = vpop.f32.mrf.mxu0  ;;  %v773_v63 = vpop.f32.mrf.mxu1  ;;  %v590_v33 = vadd.f32 %v1935_v37, %v1915_v15  ;;  %v594_v32 = vadd.f32 %v1937_v38, %v1959_v54  ;;  %v600_v38 = vadd.f32 %v1941_v41, %v1951_v48 }
 0x10a   : > { %v673_v2 = vadd.f32 %v672_v62, %v356_v17  ;;  %v774_v3 = vadd.f32 %v773_v63, %v356_v17  ;;  %v843_v17 = vmax.f32 %v477_v6, %v578_v7  ;;  %v487_v63 = vadd.f32 %v486_v39, %v1915_v15 }
 0x10b   : > { %v676_v8 = vpop.f32.mrf.mxu0  ;;  %v777_v9 = vpop.f32.mrf.mxu1  ;;  %v495_v39 = vadd.f32 %v494_v49, %v1959_v54  ;;  %v697_v49 = vadd.f32 %v1957_v53, %v1959_v54 }
 0x10c   : > { %v1517_v10 = vpack.c.bf16 %v673_v2, %v671_v61  ;;  %v1518_v11 = vpack.c.bf16 %v774_v3, %v772_v1  ;;  %v677_v12 = vadd.f32 %v676_v8, %v361_v60  ;;  %v778_v13 = vadd.f32 %v777_v9, %v361_v60 }
 0x10d   : > { %v678_v14 = vpop.f32.mrf.mxu0  ;;  %v779_v18 = vpop.f32.mrf.mxu1  ;;  %v584_v61 = vadd.f32 %v1931_v34, %v1917_v16  ;;  %v588_v1 = vadd.f32 %v1933_v35, %v1915_v15  ;;  %v489_v2 = vadd.f32 %v488_v42, %v1915_v15  ;;  %v493_v3 = vadd.f32 %v492_v45, %v1959_v54 }
 0x10e   : > { %840 = vst [vmem:[%s1923_s8 + $0x10] sm:$0xff] %v1517_v10  ;;  %841 = vst [vmem:[%s1923_s8 + $0x18] sm:$0xff] %v1518_v11  ;;  %v852_v19 = vmax.f32 %v677_v12, %v778_v13  ;;  %v679_v20 = vadd.f32 %v678_v14, %v361_v60  ;;  %v780_v21 = vadd.f32 %v779_v18, %v361_v60 }
 0x10f   : > { %v783_v22 = vpop.f32.mrf.mxu1  ;;  %v483_v60 = vadd.f32 %v482_v36, %v1917_v16  ;;  %v501_v36 = vadd.f32 %v500_v56, %v1951_v48  ;;  %v602_v34 = vadd.f32 %v1943_v43, %v1951_v48  ;;  %v596_v35 = vadd.f32 %v1939_v40, %v1959_v54 }
 0x110   : > { %v853_v24 = vmax.f32 %v679_v20, %v780_v21  ;;  %v862_v26 = vmax.f32 %v842_v23, %v852_v19  ;;  %v499_v45 = vadd.f32 %v498_v52, %v1951_v48  ;;  %v701_v56 = vadd.f32 %v700_v55, %v1951_v48 }
 0x111   : > { %v785_v25 = vpop.f32.mrf.mxu1  ;;  %v703_v40 = vadd.f32 %v1961_v57, %v1951_v48  ;;  %v851_v8 = vmax.f32 %v501_v36, %v602_v34  ;;  %v695_v52 = vadd.f32 %v1955_v51, %v1959_v54  ;;  %v691_v9 = vadd.f32 %v1953_v50, %v1915_v15 }
 0x112   : > { %v863_v27 = vmax.f32 %v843_v17, %v853_v24  ;;  %v786_v10 = vadd.f32 %v785_v25, %v1917_v16  ;;  %v850_v12 = vmax.f32 %v499_v45, %v600_v38  ;;  %v689_v57 = vadd.f32 %v1949_v47, %v1915_v15 }
 0x113   : > { %v789_v28 = vpop.f32.mrf.mxu1  ;;  %v849_v14 = vmax.f32 %v495_v39, %v596_v35  ;;  %v685_v51 = vadd.f32 %v1947_v46, %v1917_v16  ;;  %v848_v19 = vmax.f32 %v493_v3, %v594_v32  ;;  %v683_v50 = vadd.f32 %v1945_v44, %v1917_v16 }
 0x114   : > { %v1587_v29 = vpack.i.bf16 %v863_v27, %v862_v26  ;;  %v790_v41 = vadd.f32 %v789_v28, %v1915_v15  ;;  %v847_v23 = vmax.f32 %v489_v2, %v590_v33  ;;  %v845_v25 = vmax.f32 %v483_v60, %v584_v61  ;;  %v1097_v28 = vld [vmem:[%s2148_s3] sm:$0xff]  ;;  %v1103_v60 = vld [vmem:[%s2148_s3 + $0x30] sm:$0xff]  ;;  %v1104_v61 = vld [vmem:[%s2148_s3 + $0x38] sm:$0xff] }
 0x115   : > { %v791_v30 = vpop.f32.mrf.mxu1  ;;  %v855_v17 = vmax.f32 %v685_v51, %v786_v10  ;;  %v844_v46 = vmax.f32 %v1967_v58, %v1971_v59  ;;  %v1101_v58 = vld [vmem:[%s2148_s3 + $0x20] sm:$0xff]  ;;  %v1102_v59 = vld [vmem:[%s2148_s3 + $0x28] sm:$0xff] }
 0x116   : > { %1588 = vxpose.xlu0.b32.start.end [1/1] (short) %v1587_v29, 128  ;;  %v792_v6 = vadd.f32 %v791_v30, %v1915_v15  ;;  %v856_v20 = vmax.f32 %v689_v57, %v790_v41  ;;  %v846_v15 = vmax.f32 %v487_v63, %v588_v1  ;;  %v1098_v29 = vld [vmem:[%s2148_s3 + $0x8] sm:$0xff]  ;;  %v1099_v30 = vld [vmem:[%s2148_s3 + $0x10] sm:$0xff] }
 0x117   : > { %v795_v31 = vpop.f32.mrf.mxu1 }
 0x118   : > { %v796_v5 = vadd.f32 %v795_v31, %v1959_v54  ;;  %v866_v27 = vmax.f32 %v846_v15, %v856_v20  ;;  %v1100_v31 = vld [vmem:[%s2148_s3 + $0x18] sm:$0xff] }
 0x119   : > { %v797_v62 = vpop.f32.mrf.mxu1 }
 0x11a   : > { %v798_v42 = vadd.f32 %v797_v62, %v1959_v54  ;;  %v858_v13 = vmax.f32 %v695_v52, %v796_v5  ;;  %v857_v54 = vmax.f32 %v691_v9, %v792_v6 }
 0x11b   : > { %v801_v4 = vpop.f32.mrf.mxu1 }
 0x11c   : > { %v802_v37 = vadd.f32 %v801_v4, %v1951_v48  ;;  %v859_v53 = vmax.f32 %v697_v49, %v798_v42  ;;  %v867_v26 = vmax.f32 %v847_v23, %v857_v54 }
 0x11d   : > { %v803_v43 = vpop.f32.mrf.mxu1 }
 0x11e   : > { %v804_v7 = vadd.f32 %v803_v43, %v1951_v48  ;;  %v860_v55 = vmax.f32 %v701_v56, %v802_v37  ;;  %v784_v48 = vadd.f32 %v783_v22, %v1917_v16  ;;  %v869_v24 = vmax.f32 %v849_v14, %v859_v53 }
 0x11f   : > { %v868_v22 = vmax.f32 %v848_v19, %v858_v13  ;;  %v865_v16 = vmax.f32 %v845_v25, %v855_v17 }
 0x120   : > { %v861_v11 = vmax.f32 %v703_v40, %v804_v7  ;;  %v870_v21 = vmax.f32 %v850_v12, %v860_v55  ;;  %v854_v47 = vmax.f32 %v683_v50, %v784_v48 }
 0x122   : > { %v871_v18 = vmax.f32 %v851_v8, %v861_v11  ;;  %v864_v44 = vmax.f32 %v844_v46, %v854_v47 }
 0x124   : > { %1154 = vmatprep.subr.mxu0 %v871_v18 }
 0x125   : > { %1155 = vmatpush1.msra.mxu0 %v870_v21 }
 0x126   : > { %1156 = vmatprep.subr.mxu0 %v869_v24 }
 0x127   : > { %1157 = vmatpush1.msra.mxu0 %v868_v22 }
 0x128   : > { %1158 = vmatprep.subr.mxu0 %v867_v26 }
 0x129   : > { %1159 = vmatpush1.msra.mxu0 %v866_v27 }
 0x12a   : > { %1160 = vmatprep.subr.mxu0 %v865_v16 }
 0x12b   : > { %1161 = vmatpush1.msra.mxu0 %v864_v44 }
 0x12c   : > { %1493 = vmatmul.mubr.msk.f32.vlgmr.msra.gmra.mxu0 %vm1105_vm1, %v1097_v28 }
 0x12d   : > { %1200 = vmatprep.mubr.f32.mxu0 %v1677_v0 }
 0x130   : > { %1494 = vmatmul.mubr.msk.f32.gmra.mxu0 %vm1105_vm1, %v1098_v29 }
 0x131   : > { %1206 = vmatprep.mubr.f32.mxu0 %v1677_v0 }
 0x134   : > { %1495 = vmatmul.mubr.msk.f32.gmra.mxu0 %vm1105_vm1, %v1099_v30 }
 0x135   : > { %1212 = vmatprep.mubr.f32.mxu0 %v1677_v0 }
 0x138   : > { %1496 = vmatmul.mubr.msk.f32.gmra.mxu0 %vm1105_vm1, %v1100_v31 }
 0x139   : > { %1218 = vmatprep.mubr.f32.mxu0 %v1677_v0 }
 0x13c   : > { %1497 = vmatmul.mubr.msk.f32.gmra.mxu0 %vm1105_vm1, %v1101_v58 }
 0x13d   : > { %1224 = vmatprep.mubr.f32.mxu0 %v1677_v0 }
 0x140   : > { %1498 = vmatmul.mubr.msk.f32.gmra.mxu0 %vm1105_vm1, %v1102_v59 }
 0x141   : > { %1230 = vmatprep.mubr.f32.mxu0 %v1677_v0 }
 0x144   : > { %1499 = vmatmul.mubr.msk.f32.gmra.mxu0 %vm1105_vm1, %v1103_v60 }
 0x145   : > { %1236 = vmatprep.mubr.f32.mxu0 %v1677_v0 }
 0x148   : > { %1500 = vmatmul.mubr.msk.f32.gmra.mxu0 %vm1105_vm1, %v1104_v61 }
 0x192   : > { %v1589_v62 = vpop.trf.xlu0 }
 0x193   : > { %v1593_v63 = vunpack.i.h.bf16 %v1589_v62  ;;  %v1590_v1 = vunpack.i.l.bf16 %v1589_v62 }
 0x195   : > { %v1535_v0 = vpack.c.bf16 %v1593_v63, %v1593_v63  ;;  %v1519_v2 = vpack.c.bf16 %v1590_v1, %v1590_v1 }
 0x196   : > { %v1594_v33 = vpop.trf.xlu0 }
 0x197   : > { %1081 = vst.msk [vmem:[%s2062_s30 + $0x40] sm:$0xf] %vm1064_vm2, %v1535_v0  ;;  %1065 = vst.msk [vmem:[%s2062_s30] sm:$0xf] %vm1064_vm2, %v1519_v2  ;;  %v1598_v3 = vunpack.i.h.bf16 %v1594_v33  ;;  %v1595_v32 = vunpack.i.l.bf16 %v1594_v33 }
 0x199   : > { %v1536_v36 = vpack.c.bf16 %v1598_v3, %v1598_v3  ;;  %v1520_v34 = vpack.c.bf16 %v1595_v32, %v1595_v32 }
 0x19a   : > { %v1599_v4 = vpop.trf.xlu0 }
 0x19b   : > { %1082 = vst.msk [vmem:[%s2062_s30 + $0x44] sm:$0xf] %vm1064_vm2, %v1536_v36  ;;  %1066 = vst.msk [vmem:[%s2062_s30 + $0x4] sm:$0xf] %vm1064_vm2, %v1520_v34  ;;  %v1603_v39 = vunpack.i.h.bf16 %v1599_v4  ;;  %v1600_v35 = vunpack.i.l.bf16 %v1599_v4 }
 0x19d   : > { %v1537_v42 = vpack.c.bf16 %v1603_v39, %v1603_v39  ;;  %v1521_v37 = vpack.c.bf16 %v1600_v35, %v1600_v35 }
 0x19e   : > { %v1604_v45 = vpop.trf.xlu0 }
 0x19f   : > { %1083 = vst.msk [vmem:[%s2062_s30 + $0x48] sm:$0xf] %vm1064_vm2, %v1537_v42  ;;  %1067 = vst.msk [vmem:[%s2062_s30 + $0x8] sm:$0xf] %vm1064_vm2, %v1521_v37  ;;  %v1608_v38 = vunpack.i.h.bf16 %v1604_v45  ;;  %v1605_v56 = vunpack.i.l.bf16 %v1604_v45 }
 0x1a1   : > { %v1538_v5 = vpack.c.bf16 %v1608_v38, %v1608_v38  ;;  %v1522_v43 = vpack.c.bf16 %v1605_v56, %v1605_v56 }
 0x1a2   : > { %v1609_v49 = vpop.trf.xlu0 }
 0x1a3   : > { %1084 = vst.msk [vmem:[%s2062_s30 + $0x4c] sm:$0xf] %vm1064_vm2, %v1538_v5  ;;  %1068 = vst.msk [vmem:[%s2062_s30 + $0xc] sm:$0xf] %vm1064_vm2, %v1522_v43  ;;  %v1613_v40 = vunpack.i.h.bf16 %v1609_v49  ;;  %v1610_v6 = vunpack.i.l.bf16 %v1609_v49 }
 0x1a5   : > { %v1539_v7 = vpack.c.bf16 %v1613_v40, %v1613_v40  ;;  %v1523_v8 = vpack.c.bf16 %v1610_v6, %v1610_v6 }
 0x1a6   : > { %v1614_v52 = vpop.trf.xlu0 }
 0x1a7   : > { %1085 = vst.msk [vmem:[%s2062_s30 + $0x50] sm:$0xf] %vm1064_vm2, %v1539_v7  ;;  %1069 = vst.msk [vmem:[%s2062_s30 + $0x10] sm:$0xf] %vm1064_vm2, %v1523_v8  ;;  %v1618_v41 = vunpack.i.h.bf16 %v1614_v52  ;;  %v1615_v55 = vunpack.i.l.bf16 %v1614_v52 }
 0x1a9   : > { %v1540_v9 = vpack.c.bf16 %v1618_v41, %v1618_v41  ;;  %v1524_v10 = vpack.c.bf16 %v1615_v55, %v1615_v55 }
 0x1aa   : > { %v1619_v53 = vpop.trf.xlu0 }
 0x1ab   : > { %1086 = vst.msk [vmem:[%s2062_s30 + $0x54] sm:$0xf] %vm1064_vm2, %v1540_v9  ;;  %1070 = vst.msk [vmem:[%s2062_s30 + $0x14] sm:$0xf] %vm1064_vm2, %v1524_v10  ;;  %v1623_v11 = vunpack.i.h.bf16 %v1619_v53  ;;  %v1620_v12 = vunpack.i.l.bf16 %v1619_v53 }
 0x1ad   : > { %v1541_v57 = vpack.c.bf16 %v1623_v11, %v1623_v11  ;;  %v1525_v48 = vpack.c.bf16 %v1620_v12, %v1620_v12 }
 0x1ae   : > { %v1624_v13 = vpop.trf.xlu0 }
 0x1af   : > { %1087 = vst.msk [vmem:[%s2062_s30 + $0x58] sm:$0xf] %vm1064_vm2, %v1541_v57  ;;  %1071 = vst.msk [vmem:[%s2062_s30 + $0x18] sm:$0xf] %vm1064_vm2, %v1525_v48  ;;  %v1628_v14 = vunpack.i.h.bf16 %v1624_v13  ;;  %v1625_v51 = vunpack.i.l.bf16 %v1624_v13 }
 0x1b1   : > { %v1542_v54 = vpack.c.bf16 %v1628_v14, %v1628_v14  ;;  %v1526_v18 = vpack.c.bf16 %v1625_v51, %v1625_v51 }
 0x1b2   : > { %v1629_v19 = vpop.trf.xlu0 }
 0x1b3   : > { %1088 = vst.msk [vmem:[%s2062_s30 + $0x5c] sm:$0xf] %vm1064_vm2, %v1542_v54  ;;  %1072 = vst.msk [vmem:[%s2062_s30 + $0x1c] sm:$0xf] %vm1064_vm2, %v1526_v18  ;;  %v1633_v50 = vunpack.i.h.bf16 %v1629_v19  ;;  %v1630_v20 = vunpack.i.l.bf16 %v1629_v19 }
 0x1b5   : > { %v1543_v21 = vpack.c.bf16 %v1633_v50, %v1633_v50  ;;  %v1527_v23 = vpack.c.bf16 %v1630_v20, %v1630_v20 }
 0x1b6   : > { %v1634_v17 = vpop.trf.xlu0 }
 0x1b7   : > { %1089 = vst.msk [vmem:[%s2062_s30 + $0x60] sm:$0xf] %vm1064_vm2, %v1543_v21  ;;  %1073 = vst.msk [vmem:[%s2062_s30 + $0x20] sm:$0xf] %vm1064_vm2, %v1527_v23  ;;  %v1638_v24 = vunpack.i.h.bf16 %v1634_v17  ;;  %v1635_v15 = vunpack.i.l.bf16 %v1634_v17 }
 0x1b9   : > { %v1544_v47 = vpack.c.bf16 %v1638_v24, %v1638_v24  ;;  %v1528_v22 = vpack.c.bf16 %v1635_v15, %v1635_v15 }
 0x1ba   : > { %v1639_v25 = vpop.trf.xlu0 }
 0x1bb   : > { %1090 = vst.msk [vmem:[%s2062_s30 + $0x64] sm:$0xf] %vm1064_vm2, %v1544_v47  ;;  %1074 = vst.msk [vmem:[%s2062_s30 + $0x24] sm:$0xf] %vm1064_vm2, %v1528_v22  ;;  %v1643_v26 = vunpack.i.h.bf16 %v1639_v25  ;;  %v1640_v46 = vunpack.i.l.bf16 %v1639_v25 }
 0x1bd   : > { %v1545_v27 = vpack.c.bf16 %v1643_v26, %v1643_v26  ;;  %v1529_v16 = vpack.c.bf16 %v1640_v46, %v1640_v46 }
 0x1be   : > { %v1644_v44 = vpop.trf.xlu0 }
 0x1bf   : > { %1091 = vst.msk [vmem:[%s2062_s30 + $0x68] sm:$0xf] %vm1064_vm2, %v1545_v27  ;;  %1075 = vst.msk [vmem:[%s2062_s30 + $0x28] sm:$0xf] %vm1064_vm2, %v1529_v16  ;;  %v1648_v28 = vunpack.i.h.bf16 %v1644_v44  ;;  %v1645_v29 = vunpack.i.l.bf16 %v1644_v44 }
 0x1c1   : > { %v1546_v30 = vpack.c.bf16 %v1648_v28, %v1648_v28  ;;  %v1530_v31 = vpack.c.bf16 %v1645_v29, %v1645_v29 }
 0x1c2   : > { %v1649_v58 = vpop.trf.xlu0 }
 0x1c3   : > { %1092 = vst.msk [vmem:[%s2062_s30 + $0x6c] sm:$0xf] %vm1064_vm2, %v1546_v30  ;;  %1076 = vst.msk [vmem:[%s2062_s30 + $0x2c] sm:$0xf] %vm1064_vm2, %v1530_v31  ;;  %v1653_v59 = vunpack.i.h.bf16 %v1649_v58  ;;  %v1650_v60 = vunpack.i.l.bf16 %v1649_v58 }
 0x1c5   : > { %v1547_v61 = vpack.c.bf16 %v1653_v59, %v1653_v59  ;;  %v1531_v62 = vpack.c.bf16 %v1650_v60, %v1650_v60 }
 0x1c6   : > { %v1654_v63 = vpop.trf.xlu0 }
 0x1c7   : > { %1093 = vst.msk [vmem:[%s2062_s30 + $0x70] sm:$0xf] %vm1064_vm2, %v1547_v61  ;;  %1077 = vst.msk [vmem:[%s2062_s30 + $0x30] sm:$0xf] %vm1064_vm2, %v1531_v62  ;;  %v1658_v1 = vunpack.i.h.bf16 %v1654_v63  ;;  %v1655_v0 = vunpack.i.l.bf16 %v1654_v63 }
 0x1c9   : > { %v1548_v2 = vpack.c.bf16 %v1658_v1, %v1658_v1  ;;  %v1532_v33 = vpack.c.bf16 %v1655_v0, %v1655_v0 }
 0x1ca   : > { %v1659_v3 = vpop.trf.xlu0 }
 0x1cb   : > { %1094 = vst.msk [vmem:[%s2062_s30 + $0x74] sm:$0xf] %vm1064_vm2, %v1548_v2  ;;  %1078 = vst.msk [vmem:[%s2062_s30 + $0x34] sm:$0xf] %vm1064_vm2, %v1532_v33  ;;  %v1663_v32 = vunpack.i.h.bf16 %v1659_v3  ;;  %v1660_v36 = vunpack.i.l.bf16 %v1659_v3 }
 0x1cd   : > { %v1549_v34 = vpack.c.bf16 %v1663_v32, %v1663_v32  ;;  %v1533_v4 = vpack.c.bf16 %v1660_v36, %v1660_v36 }
 0x1ce   : > { %v1664_v39 = vpop.trf.xlu0 }
 0x1cf   : > { %1095 = vst.msk [vmem:[%s2062_s30 + $0x78] sm:$0xf] %vm1064_vm2, %v1549_v34  ;;  %1079 = vst.msk [vmem:[%s2062_s30 + $0x38] sm:$0xf] %vm1064_vm2, %v1533_v4  ;;  %v1668_v35 = vunpack.i.h.bf16 %v1664_v39  ;;  %v1665_v42 = vunpack.i.l.bf16 %v1664_v39 }
 0x1d1   : > { %v1550_v37 = vpack.c.bf16 %v1668_v35, %v1668_v35  ;;  %v1534_v45 = vpack.c.bf16 %v1665_v42, %v1665_v42 }
 0x1d3   : > { %1096 = vst.msk [vmem:[%s2062_s30 + $0x7c] sm:$0xf] %vm1064_vm2, %v1550_v37  ;;  %1080 = vst.msk [vmem:[%s2062_s30 + $0x3c] sm:$0xf] %vm1064_vm2, %v1534_v45 }
 0x1ec   : > { %v1196_v38 = vpop.f32.mrf.mxu0 }
 0x1ee   : > { %v1198_v56 = vpop.f32.mrf.mxu0 }
 0x1ef   : > { %v1551_v5 = vpack.c.bf16 %v1198_v56, %v1196_v38 }
 0x1f0   : > { %v1202_v43 = vpop.f32.mrf.mxu0 }
 0x1f1   : > { %1291 = vst [vmem:[%s2132_s10] sm:$0xff] %v1551_v5 }
 0x1f2   : > { %v1204_v49 = vpop.f32.mrf.mxu0 }
 0x1f3   : > { %v1552_v40 = vpack.c.bf16 %v1204_v49, %v1202_v43 }
 0x1f4   : > { %v1208_v6 = vpop.f32.mrf.mxu0 }
 0x1f5   : > { %1292 = vst [vmem:[%s2132_s10 + $0x8] sm:$0xff] %v1552_v40 }
 0x1f6   : > { %v1210_v7 = vpop.f32.mrf.mxu0 }
 0x1f7   : > { %v1553_v8 = vpack.c.bf16 %v1210_v7, %v1208_v6 }
 0x1f8   : > { %v1214_v52 = vpop.f32.mrf.mxu0 }
 0x1f9   : > { %1293 = vst [vmem:[%s2132_s10 + $0x10] sm:$0xff] %v1553_v8 }
 0x1fa   : > { %v1216_v41 = vpop.f32.mrf.mxu0 }
 0x1fb   : > { %v1554_v55 = vpack.c.bf16 %v1216_v41, %v1214_v52 }
 0x1fc   : > { %v1220_v9 = vpop.f32.mrf.mxu0 }
 0x1fd   : > { %1294 = vst [vmem:[%s2132_s10 + $0x18] sm:$0xff] %v1554_v55 }
 0x1fe   : > { %v1222_v10 = vpop.f32.mrf.mxu0 }
 0x1ff   : > { %v1555_v53 = vpack.c.bf16 %v1222_v10, %v1220_v9 }
 0x200   : > { %v1226_v11 = vpop.f32.mrf.mxu0 }
 0x201   : > { %1295 = vst [vmem:[%s2132_s10 + $0x20] sm:$0xff] %v1555_v53 }
 0x202   : > { %v1228_v12 = vpop.f32.mrf.mxu0 }
 0x203   : > { %v1556_v57 = vpack.c.bf16 %v1228_v12, %v1226_v11 }
 0x204   : > { %v1232_v48 = vpop.f32.mrf.mxu0 }
 0x205   : > { %1296 = vst [vmem:[%s2132_s10 + $0x28] sm:$0xff] %v1556_v57 }
 0x206   : > { %v1234_v13 = vpop.f32.mrf.mxu0 }
 0x207   : > { %v1557_v14 = vpack.c.bf16 %v1234_v13, %v1232_v48 }
 0x208   : > { %v1238_v51 = vpop.f32.mrf.mxu0 }
 0x209   : > { %1297 = vst [vmem:[%s2132_s10 + $0x30] sm:$0xff] %v1557_v14 }
 0x20a   : > { %v1240_v54 = vpop.f32.mrf.mxu0 }
 0x20b   : > { %v1558_v18 = vpack.c.bf16 %v1240_v54, %v1238_v51 }
 0x20d   : > { %1298 = vst [vmem:[%s2132_s10 + $0x38] sm:$0xff] %v1558_v18 }
 0x20e PF: > { %s17_s21 = sadd.s32 1, %s1675_s21  }
 0x20f   : > { %p14_p4 = scmp.ge.s32.totalorder %s17_s21, 4  }
 0x211   :  { %16 = sbr.rel (!%p14_p4) target bundleno = 1 (0x1), region = 90 }

</bundles_post_ra>
